<compile_context>
chip_gen: v5e
topology: v5e:2x2
jax: 0.10.0
libtpu: 0.0.40
codegen_flags: <defaults>
</compile_context>

<pallas_src>
import functools

import jax
import jax.numpy as jnp
from jax.experimental import pallas as pl
from jax.experimental.pallas import tpu as pltpu

H = 768                 # embedding_dim of Linear1HEADMLM
N_SENT = 4              # out_sent output features
N_SENT_PAD = 128        # padded to one lane-dense block
N_VOCAB = 64001         # MLM output features
N_VOCAB_PAD = 65536     # round_up(64001, 8192)
LN_EPS = 1e-5           # PyTorch nn.LayerNorm default
MAX_TILE_M = 512        # row tile cap (fits VMEM with bf16 logits)
VMEM_LIMIT_SMALL = 32 * 1024 * 1024   # prologue kernels (safe everywhere)


def _round_up(x, m):
    return ((x + m - 1) // m) * m


def _mlm_config():
    """(tile_n, vmem_limit_bytes) for the MLM linear, per TPU generation."""
    try:
        kind = jax.devices()[0].device_kind.lower()
    except Exception:  # pragma: no cover - defensive
        kind = ""
    if "v7" in kind:
        # v7x: only 64 MiB VMEM per TensorCore -> keep the smaller tile.
        return 4096, 40 * 1024 * 1024
    # v5e / v6e (and other 128 MiB-VMEM chips): bigger tile, fewer grid steps.
    return 8192, 64 * 1024 * 1024


# -----------------------------------------------------------------------------
# Kernel 1: fused  Linear -> SiLU -> LayerNorm -> out_sent Linear  (sent head)
# -----------------------------------------------------------------------------
def _sent_head_kernel(x_ref, w1_ref, b1_ref, g1_ref, beta1_ref,
                      ws_ref, bs_ref, o_ref):
    # x:(tm,H) bf16   w1:(H,H) bf16   b1,g1,beta1:(1,H) f32
    # ws:(H,128) bf16   bs:(1,128) f32   o:(tm,128) f32
    h = jnp.dot(x_ref[...], w1_ref[...], preferred_element_type=jnp.float32)
    h = h + b1_ref[...]
    h = h * jax.nn.sigmoid(h)                           # SiLU (f32)
    # One-pass LayerNorm statistics: var = E[x^2] - mean^2 (biased, as in torch)
    mean = jnp.mean(h, axis=-1, keepdims=True)
    mean_sq = jnp.mean(h * h, axis=-1, keepdims=True)
    var = jnp.maximum(mean_sq - mean * mean, 0.0)
    hn = (h - mean) * jax.lax.rsqrt(var + LN_EPS)
    hn = hn * g1_ref[...] + beta1_ref[...]
    o_ref[...] = (jnp.dot(hn.astype(jnp.bfloat16), ws_ref[...],
                          preferred_element_type=jnp.float32) + bs_ref[...])


def sent_head(x, w1, b1, g1, beta1, w_sent, b_sent, tile_m):
    m_pad = x.shape[0]
    return pl.pallas_call(
        _sent_head_kernel,
        out_shape=jax.ShapeDtypeStruct((m_pad, N_SENT_PAD), jnp.float32),
        grid_spec=pltpu.PrefetchScalarGridSpec(
            num_scalar_prefetch=0,
            grid=(m_pad // tile_m,),
            in_specs=[
                pl.BlockSpec((tile_m, H), lambda i: (i, 0)),
                pl.BlockSpec((H, H), lambda i: (0, 0)),
                pl.BlockSpec((1, H), lambda i: (0, 0)),
                pl.BlockSpec((1, H), lambda i: (0, 0)),
                pl.BlockSpec((1, H), lambda i: (0, 0)),
                pl.BlockSpec((H, N_SENT_PAD), lambda i: (0, 0)),
                pl.BlockSpec((1, N_SENT_PAD), lambda i: (0, 0)),
            ],
            out_specs=pl.BlockSpec((tile_m, N_SENT_PAD), lambda i: (i, 0)),
        ),
        compiler_params=pltpu.CompilerParams(
            dimension_semantics=("parallel",),
            vmem_limit_bytes=VMEM_LIMIT_SMALL,
        ),
    )(x, w1, b1.reshape(1, H), g1.reshape(1, H), beta1.reshape(1, H),
      w_sent, b_sent.reshape(1, N_SENT_PAD))


# -----------------------------------------------------------------------------
# Kernel 2: Linear -> SiLU -> LayerNorm   (MLM branch prologue, bf16 output)
# -----------------------------------------------------------------------------
def _fc_silu_ln_kernel(x_ref, w_ref, b_ref, g_ref, beta_ref, o_ref):
    h = jnp.dot(x_ref[...], w_ref[...], preferred_element_type=jnp.float32)
    h = h + b_ref[...]
    h = h * jax.nn.sigmoid(h)
    mean = jnp.mean(h, axis=-1, keepdims=True)
    mean_sq = jnp.mean(h * h, axis=-1, keepdims=True)
    var = jnp.maximum(mean_sq - mean * mean, 0.0)
    hn = (h - mean) * jax.lax.rsqrt(var + LN_EPS)
    o_ref[...] = (hn * g_ref[...] + beta_ref[...]).astype(o_ref.dtype)


def fc_silu_ln(x, w, b, g, beta, tile_m):
    m_pad = x.shape[0]
    return pl.pallas_call(
        _fc_silu_ln_kernel,
        out_shape=jax.ShapeDtypeStruct((m_pad, H), jnp.bfloat16),
        grid_spec=pltpu.PrefetchScalarGridSpec(
            num_scalar_prefetch=0,
            grid=(m_pad // tile_m,),
            in_specs=[
                pl.BlockSpec((tile_m, H), lambda i: (i, 0)),
                pl.BlockSpec((H, H), lambda i: (0, 0)),
                pl.BlockSpec((1, H), lambda i: (0, 0)),
                pl.BlockSpec((1, H), lambda i: (0, 0)),
                pl.BlockSpec((1, H), lambda i: (0, 0)),
            ],
            out_specs=pl.BlockSpec((tile_m, H), lambda i: (i, 0)),
        ),
        compiler_params=pltpu.CompilerParams(
            dimension_semantics=("parallel",),
            vmem_limit_bytes=VMEM_LIMIT_SMALL,
        ),
    )(x, w, b.reshape(1, H), g.reshape(1, H), beta.reshape(1, H))


# -----------------------------------------------------------------------------
# Kernel 3: MLM linear with int8 weight streaming, per-column f32 scales,
#           bf16 logits.  Grid: (N outer parallel, M inner arbitrary).
# -----------------------------------------------------------------------------
def _mlm_linear_kernel(x_ref, wq_ref, s_ref, b_ref, o_ref):
    # x:(tm,H) bf16   wq:(H,tn) int8   s,b:(1,tn) f32   o:(tm,tn) bf16
    # Dequantize the int8 tile to bf16 in VMEM (int8 values are exact in bf16);
    # the per-column scale is applied to the f32 accumulator after the dot.
    w = wq_ref[...].astype(jnp.float32).astype(jnp.bfloat16)
    acc = jnp.dot(x_ref[...], w, preferred_element_type=jnp.float32)
    o_ref[...] = (acc * s_ref[...] + b_ref[...]).astype(o_ref.dtype)


def mlm_linear(x, w_q, scale, b, tile_m, tile_n, vmem_limit):
    """x:(M_pad,H) bf16, w_q:(H,N_pad) int8, scale,b:(N_pad,) f32 -> bf16 logits."""
    m_pad = x.shape[0]
    n_pad = w_q.shape[1]
    assert m_pad % tile_m == 0 and n_pad % tile_n == 0
    # N outer: the large weight stream is read exactly once (not per row tile),
    # and a v7x megacore split on the leading axis halves each TC's weight DMA.
    return pl.pallas_call(
        _mlm_linear_kernel,
        out_shape=jax.ShapeDtypeStruct((m_pad, n_pad), jnp.bfloat16),
        grid_spec=pltpu.PrefetchScalarGridSpec(
            num_scalar_prefetch=0,
            grid=(n_pad // tile_n, m_pad // tile_m),
            in_specs=[
                pl.BlockSpec((tile_m, H), lambda j, i: (i, 0)),
                pl.BlockSpec((H, tile_n), lambda j, i: (0, j)),
                pl.BlockSpec((1, tile_n), lambda j, i: (0, j)),
                pl.BlockSpec((1, tile_n), lambda j, i: (0, j)),
            ],
            out_specs=pl.BlockSpec((tile_m, tile_n), lambda j, i: (i, j)),
        ),
        compiler_params=pltpu.CompilerParams(
            dimension_semantics=("parallel", "arbitrary"),
            vmem_limit_bytes=vmem_limit,
        ),
    )(x, w_q, scale.reshape(1, n_pad), b.reshape(1, n_pad))


# -----------------------------------------------------------------------------
# Parameter construction (deterministic, synthetic)
# -----------------------------------------------------------------------------
def init_head_params(key):
    ks = jax.random.split(key, 6)
    p = {}
    # fc_input / fc_input2 : (H, H) stored as (in, out), bf16
    p["w1"] = (jax.random.normal(ks[0], (H, H), jnp.float32) * 0.02).astype(jnp.bfloat16)
    p["b1"] = jnp.zeros((H,), jnp.float32)
    p["w2"] = (jax.random.normal(ks[1], (H, H), jnp.float32) * 0.02).astype(jnp.bfloat16)
    p["b2"] = jnp.zeros((H,), jnp.float32)
    # LayerNorms
    p["g1"] = jnp.ones((H,), jnp.float32)
    p["beta1"] = jnp.zeros((H,), jnp.float32)
    p["g2"] = jnp.ones((H,), jnp.float32)
    p["beta2"] = jnp.zeros((H,), jnp.float32)
    # out_sent : H -> 4   (output features padded to 128 lanes), bf16
    w_sent = (jax.random.normal(ks[2], (H, N_SENT), jnp.float32) * 0.02).astype(jnp.bfloat16)
    b_sent = jax.random.normal(ks[3], (N_SENT,), jnp.float32) * 0.02
    p["w_sent"] = jnp.zeros((H, N_SENT_PAD), jnp.bfloat16).at[:, :N_SENT].set(w_sent)
    p["b_sent"] = jnp.zeros((N_SENT_PAD,), jnp.float32).at[:N_SENT].set(b_sent)
    # MLM : H -> 64001, quantized to int8 with per-output-column f32 scales,
    # padded to 65536 columns (padded cols have zero weight / zero bias).
    w_mlm = jax.random.normal(ks[4], (H, N_VOCAB), jnp.float32) * 0.02
    b_mlm = jax.random.normal(ks[5], (N_VOCAB,), jnp.float32) * 0.02
    absmax = jnp.max(jnp.abs(w_mlm), axis=0)                    # (N_VOCAB,)
    scale = jnp.maximum(absmax, 1e-6) / 127.0
    w_q = jnp.clip(jnp.round(w_mlm / scale), -127.0, 127.0).astype(jnp.int8)
    p["w_mlm_q"] = jnp.zeros((H, N_VOCAB_PAD), jnp.int8).at[:, :N_VOCAB].set(w_q)
    p["s_mlm"] = jnp.ones((N_VOCAB_PAD,), jnp.float32).at[:N_VOCAB].set(scale)
    p["b_mlm"] = jnp.zeros((N_VOCAB_PAD,), jnp.float32).at[:N_VOCAB].set(b_mlm)
    return p


# -----------------------------------------------------------------------------
# Head forward (Linear1HEADMLM.forward semantics)
# -----------------------------------------------------------------------------
def _prep_rows(x):
    """Pad rows to a multiple of the chosen row tile; return (x_pad, m, tile_m)."""
    m = x.shape[0]
    m8 = _round_up(max(m, 8), 8)
    tile_m = min(m8, MAX_TILE_M)
    m_pad = _round_up(m8, tile_m)
    if m_pad != m:
        x = jnp.pad(x, ((0, m_pad - m), (0, 0)))
    return x, m, tile_m


@functools.partial(jax.jit, static_argnames=("mlm",))
def head_forward(params, encoded, encoded2=None, mlm=False):
    """encoded: (B, H) CLS vectors.  encoded2: (B, S, H) token vectors (if mlm).

    Returns sent logits (B, 4); if mlm=True also returns MLM logits of shape
    (B, S, N_VOCAB_PAD) in bf16 -- columns >= N_VOCAB are padding and must be
    masked/ignored by the consumer (avoids a full-tensor slice copy).
    """
    tile_n_mlm, vmem_mlm = _mlm_config()
    # Pre-cast activations to bf16 (same rounding as the old in-kernel cast),
    # halving the prologue input DMA stream.
    x, m, tile_m = _prep_rows(encoded.astype(jnp.bfloat16))
    sent = sent_head(x, params["w1"], params["b1"], params["g1"], params["beta1"],
                     params["w_sent"], params["b_sent"], tile_m)[:m, :N_SENT]
    if not mlm:
        return sent
    b, s, _ = encoded2.shape
    x2, m2, tile_m2 = _prep_rows(encoded2.reshape(b * s, H).astype(jnp.bfloat16))
    emb2 = fc_silu_ln(x2, params["w2"], params["b2"],
                      params["g2"], params["beta2"], tile_m2)
    mlm_out = mlm_linear(emb2, params["w_mlm_q"], params["s_mlm"], params["b_mlm"],
                         tile_m2, tile_n_mlm, vmem_mlm)
    # Slice rows only (cheap); keep padded vocab columns to avoid copying the
    # multi-GB logits tensor at large M.
    mlm_out = mlm_out[:m2].reshape(b, s, N_VOCAB_PAD)
    return sent, mlm_out


# -----------------------------------------------------------------------------
# Pure-JAX reference (mirrors bf16/int8 operand rounding; f32 accumulate)
# -----------------------------------------------------------------------------
def _ref_fc_silu_ln(x, w_bf16, b, g, beta):
    h = jnp.dot(x.astype(jnp.bfloat16), w_bf16,
                preferred_element_type=jnp.float32) + b
    h = h * jax.nn.sigmoid(h)
    mean = jnp.mean(h, axis=-1, keepdims=True)
    var = jnp.mean(jnp.square(h - mean), axis=-1, keepdims=True)
    return (h - mean) * jax.lax.rsqrt(var + LN_EPS) * g + beta


def ref_forward(params, encoded, encoded2, mlm=True):
    emb = _ref_fc_silu_ln(encoded, params["w1"], params["b1"],
                          params["g1"], params["beta1"])
    sent = (jnp.dot(emb.astype(jnp.bfloat16), params["w_sent"][:, :N_SENT],
                    preferred_element_type=jnp.float32)
            + params["b_sent"][:N_SENT])
    if not mlm:
        return sent
    emb2 = _ref_fc_silu_ln(encoded2, params["w2"], params["b2"],
                           params["g2"], params["beta2"]).astype(jnp.bfloat16)
    wq = params["w_mlm_q"][:, :N_VOCAB].astype(jnp.float32).astype(jnp.bfloat16)
    mlm_out = (jnp.dot(emb2, wq, preferred_element_type=jnp.float32)
               * params["s_mlm"][:N_VOCAB] + params["b_mlm"][:N_VOCAB])
    return sent, mlm_out


# -----------------------------------------------------------------------------
if __name__ == "__main__":
    key = jax.random.PRNGKey(0)
    k_param, k_h1, k_h2 = jax.random.split(key, 3)

    params = init_head_params(k_param)

    B, S = 2, 8
    # Synthetic stand-ins for BertModel(...).last_hidden_state
    last_hidden = jax.random.normal(k_h1, (B, S, H), jnp.float32)
    last_hidden2 = jax.random.normal(k_h2, (B, S, H), jnp.float32)

    encoded = last_hidden[:, 0, :]          # CLS pooling, as in the PyTorch model
    encoded2 = last_hidden2                 # full sequence for the MLM branch

    # mlm=False path (the module's default forward)
    sent_only = head_forward(params, encoded, mlm=False)
    sent_only = jax.block_until_ready(sent_only)

    # mlm=True path -> (sent, mlm)
    sent, mlm_out = head_forward(params, encoded, encoded2, mlm=True)
    sent = jax.block_until_ready(sent)
    mlm_out = jax.block_until_ready(mlm_out)

    assert sent_only.shape == (B, N_SENT)
    assert sent.shape == (B, N_SENT)
    assert mlm_out.shape == (B, S, N_VOCAB_PAD)
    assert mlm_out.dtype == jnp.bfloat16

    # Sanity check against a pure-JAX reference (same bf16/int8 rounding)
    sent_ref, mlm_ref = ref_forward(params, encoded, encoded2, mlm=True)
    assert jnp.allclose(sent_only, sent_ref, atol=2e-2, rtol=2e-2)
    assert jnp.allclose(sent, sent_ref, atol=2e-2, rtol=2e-2)
    mlm_valid = mlm_out[..., :N_VOCAB].astype(jnp.float32)
    assert jnp.allclose(mlm_valid, mlm_ref, atol=2e-2, rtol=2e-2)

    print("KERNEL_OK")
</pallas_src>

<mosaic_0001>
module attributes {stable_mosaic.version = 11 : i64} {
  func.func @_sent_head_kernel(%arg0: i32, %arg1: memref<8x768xbf16, #tpu.memory_space<vmem>>, %arg2: memref<768x768xbf16, #tpu.memory_space<vmem>>, %arg3: memref<1x768xf32, #tpu.memory_space<vmem>>, %arg4: memref<1x768xf32, #tpu.memory_space<vmem>>, %arg5: memref<1x768xf32, #tpu.memory_space<vmem>>, %arg6: memref<768x128xbf16, #tpu.memory_space<vmem>>, %arg7: memref<1x128xf32, #tpu.memory_space<vmem>>, %arg8: memref<8x128xf32, #tpu.memory_space<vmem>>) attributes {dimension_semantics = [#tpu.dimension_semantics<parallel>], iteration_bounds = array<i64: 1>, scalar_prefetch = 0 : i64, scratch_operands = 0 : i64, tpu.core_type = #tpu.core_type<tc>, window_params = [{transform_indices = @transform_0, window_bounds = array<i64: 8, 768>}, {pipeline_mode = #tpu.pipeline_mode<synchronous>, transform_indices = @transform_1, window_bounds = array<i64: 768, 768>}, {pipeline_mode = #tpu.pipeline_mode<synchronous>, transform_indices = @transform_2, window_bounds = array<i64: 1, 768>}, {pipeline_mode = #tpu.pipeline_mode<synchronous>, transform_indices = @transform_3, window_bounds = array<i64: 1, 768>}, {pipeline_mode = #tpu.pipeline_mode<synchronous>, transform_indices = @transform_4, window_bounds = array<i64: 1, 768>}, {pipeline_mode = #tpu.pipeline_mode<synchronous>, transform_indices = @transform_5, window_bounds = array<i64: 768, 128>}, {pipeline_mode = #tpu.pipeline_mode<synchronous>, transform_indices = @transform_6, window_bounds = array<i64: 1, 128>}, {transform_indices = @transform_7, window_bounds = array<i64: 8, 128>}]} {
    %c0 = arith.constant 0 : index
    %c0_0 = arith.constant 0 : index
    %0 = vector.load %arg1[%c0, %c0_0] : memref<8x768xbf16, #tpu.memory_space<vmem>>, vector<8x768xbf16>
    %c0_1 = arith.constant 0 : index
    %c0_2 = arith.constant 0 : index
    %1 = vector.load %arg2[%c0_1, %c0_2] : memref<768x768xbf16, #tpu.memory_space<vmem>>, vector<768x768xbf16>
    %cst = arith.constant dense<0.000000e+00> : vector<8x768xf32>
    %2 = tpu.matmul %0, %1, %cst {dimension_numbers = #tpu.dot_dimension_numbers<[1], [0], [0], [1], [0, 0, 1, 1], [], []>} : vector<8x768xbf16>, vector<768x768xbf16>, vector<8x768xf32> -> vector<8x768xf32>
    %c0_3 = arith.constant 0 : index
    %c0_4 = arith.constant 0 : index
    %3 = vector.load %arg3[%c0_3, %c0_4] : memref<1x768xf32, #tpu.memory_space<vmem>>, vector<1x768xf32>
    %4 = vector.broadcast %3 : vector<1x768xf32> to vector<8x768xf32>
    %5 = arith.addf %2, %4 : vector<8x768xf32>
    %6 = arith.negf %5 : vector<8x768xf32>
    %7 = math.exp %6 : vector<8x768xf32>
    %cst_5 = arith.constant 1.000000e+00 : f32
    %8 = vector.broadcast %cst_5 : f32 to vector<8x768xf32>
    %9 = arith.addf %8, %7 : vector<8x768xf32>
    %10 = arith.divf %8, %9 : vector<8x768xf32>
    %11 = arith.mulf %5, %10 : vector<8x768xf32>
    %cst_6 = arith.constant dense<0.000000e+00> : vector<8xf32>
    %12 = vector.multi_reduction <add>, %11, %cst_6 [1] : vector<8x768xf32> to vector<8xf32>
    %13 = vector.shape_cast %12 : vector<8xf32> to vector<8x1xf32>
    %cst_7 = arith.constant 7.680000e+02 : f32
    %14 = vector.broadcast %cst_7 : f32 to vector<8x1xf32>
    %15 = arith.divf %13, %14 : vector<8x1xf32>
    %16 = arith.mulf %11, %11 : vector<8x768xf32>
    %cst_8 = arith.constant dense<0.000000e+00> : vector<8xf32>
    %17 = vector.multi_reduction <add>, %16, %cst_8 [1] : vector<8x768xf32> to vector<8xf32>
    %18 = vector.shape_cast %17 : vector<8xf32> to vector<8x1xf32>
    %cst_9 = arith.constant 7.680000e+02 : f32
    %19 = vector.broadcast %cst_9 : f32 to vector<8x1xf32>
    %20 = arith.divf %18, %19 : vector<8x1xf32>
    %21 = arith.mulf %15, %15 : vector<8x1xf32>
    %22 = arith.subf %20, %21 : vector<8x1xf32>
    %cst_10 = arith.constant 0.000000e+00 : f32
    %23 = vector.broadcast %cst_10 : f32 to vector<8x1xf32>
    %24 = arith.maximumf %22, %23 : vector<8x1xf32>
    %25 = vector.broadcast %15 : vector<8x1xf32> to vector<8x768xf32>
    %26 = arith.subf %11, %25 : vector<8x768xf32>
    %cst_11 = arith.constant 9.99999974E-6 : f32
    %27 = vector.broadcast %cst_11 : f32 to vector<8x1xf32>
    %28 = arith.addf %24, %27 : vector<8x1xf32>
    %29 = math.rsqrt %28 : vector<8x1xf32>
    %30 = vector.broadcast %29 : vector<8x1xf32> to vector<8x768xf32>
    %31 = arith.mulf %26, %30 : vector<8x768xf32>
    %c0_12 = arith.constant 0 : index
    %c0_13 = arith.constant 0 : index
    %32 = vector.load %arg4[%c0_12, %c0_13] : memref<1x768xf32, #tpu.memory_space<vmem>>, vector<1x768xf32>
    %33 = vector.broadcast %32 : vector<1x768xf32> to vector<8x768xf32>
    %34 = arith.mulf %31, %33 : vector<8x768xf32>
    %c0_14 = arith.constant 0 : index
    %c0_15 = arith.constant 0 : index
    %35 = vector.load %arg5[%c0_14, %c0_15] : memref<1x768xf32, #tpu.memory_space<vmem>>, vector<1x768xf32>
    %36 = vector.broadcast %35 : vector<1x768xf32> to vector<8x768xf32>
    %37 = arith.addf %34, %36 : vector<8x768xf32>
    %38 = arith.truncf %37 : vector<8x768xf32> to vector<8x768xbf16>
    %c0_16 = arith.constant 0 : index
    %c0_17 = arith.constant 0 : index
    %39 = vector.load %arg6[%c0_16, %c0_17] : memref<768x128xbf16, #tpu.memory_space<vmem>>, vector<768x128xbf16>
    %cst_18 = arith.constant dense<0.000000e+00> : vector<8x128xf32>
    %40 = tpu.matmul %38, %39, %cst_18 {dimension_numbers = #tpu.dot_dimension_numbers<[1], [0], [0], [1], [0, 0, 1, 1], [], []>} : vector<8x768xbf16>, vector<768x128xbf16>, vector<8x128xf32> -> vector<8x128xf32>
    %c0_19 = arith.constant 0 : index
    %c0_20 = arith.constant 0 : index
    %41 = vector.load %arg7[%c0_19, %c0_20] : memref<1x128xf32, #tpu.memory_space<vmem>>, vector<1x128xf32>
    %42 = vector.broadcast %41 : vector<1x128xf32> to vector<8x128xf32>
    %43 = arith.addf %40, %42 : vector<8x128xf32>
    %c0_21 = arith.constant 0 : index
    %c0_22 = arith.constant 0 : index
    %44 = vector.load %arg8[%c0_21, %c0_22] : memref<8x128xf32, #tpu.memory_space<vmem>>, vector<8x128xf32>
    tpu.vector_store %arg8[%c0_21, %c0_22], %43 {strides = array<i32>} : memref<8x128xf32, #tpu.memory_space<vmem>>, vector<8x128xf32>,
    return
  }
  func.func @transform_0(%arg0: i32) -> (i32, i32) {
    %c0_i32 = arith.constant 0 : i32
    %c0_i32_0 = arith.constant 0 : i32
    return %arg0, %c0_i32 : i32, i32
  }
  func.func @transform_1(%arg0: i32) -> (i32, i32) {
    %c0_i32 = arith.constant 0 : i32
    %c0_i32_0 = arith.constant 0 : i32
    %c0_i32_1 = arith.constant 0 : i32
    return %c0_i32, %c0_i32_0 : i32, i32
  }
  func.func @transform_2(%arg0: i32) -> (i32, i32) {
    %c0_i32 = arith.constant 0 : i32
    %c0_i32_0 = arith.constant 0 : i32
    %c0_i32_1 = arith.constant 0 : i32
    return %c0_i32, %c0_i32_0 : i32, i32
  }
  func.func @transform_3(%arg0: i32) -> (i32, i32) {
    %c0_i32 = arith.constant 0 : i32
    %c0_i32_0 = arith.constant 0 : i32
    %c0_i32_1 = arith.constant 0 : i32
    return %c0_i32, %c0_i32_0 : i32, i32
  }
  func.func @transform_4(%arg0: i32) -> (i32, i32) {
    %c0_i32 = arith.constant 0 : i32
    %c0_i32_0 = arith.constant 0 : i32
    %c0_i32_1 = arith.constant 0 : i32
    return %c0_i32, %c0_i32_0 : i32, i32
  }
  func.func @transform_5(%arg0: i32) -> (i32, i32) {
    %c0_i32 = arith.constant 0 : i32
    %c0_i32_0 = arith.constant 0 : i32
    %c0_i32_1 = arith.constant 0 : i32
    return %c0_i32, %c0_i32_0 : i32, i32
  }
  func.func @transform_6(%arg0: i32) -> (i32, i32) {
    %c0_i32 = arith.constant 0 : i32
    %c0_i32_0 = arith.constant 0 : i32
    %c0_i32_1 = arith.constant 0 : i32
    return %c0_i32, %c0_i32_0 : i32, i32
  }
  func.func @transform_7(%arg0: i32) -> (i32, i32) {
    %c0_i32 = arith.constant 0 : i32
    %c0_i32_0 = arith.constant 0 : i32
    return %arg0, %c0_i32 : i32, i32
  }
}

</mosaic_0001>

<bundles_post_ra>
// kernel: head_forward.1
= control target key start
LH: loop header
LB: loop body
LE: loop exit
PB: predicated region body
PF: predicated region fallthrough
CT: control target
= control target key end

     0   :  { %12 = vsyncpa [#allocation3], 0  ;;  %s5119_s0 = inlined_call_operand.vmem [shape: bf16[8,768], index: 0, kind: input, shape index: {}]   ;;  %s5120_s1 = inlined_call_operand.hbm [shape: bf16[768,768], index: 1, kind: input, shape index: {}]   ;;  %s5121_s2 = inlined_call_operand.vmem [shape: f32[1,768], index: 2, kind: input, shape index: {}]   ;;  %s5122_s3 = inlined_call_operand.vmem [shape: f32[1,768], index: 3, kind: input, shape index: {}]   ;;  %s5123_s4 = inlined_call_operand.vmem [shape: f32[1,768], index: 4, kind: input, shape index: {}]   ;;  %s5124_s5 = inlined_call_operand.hbm [shape: bf16[768,128], index: 5, kind: input, shape index: {}]   ;;  %s5125_s6 = inlined_call_operand.hbm [shape: f32[1,128], index: 6, kind: input, shape index: {}]   ;;  %s5126_s7 = inlined_call_operand.vmem [shape: f32[8,128], index: 7, kind: output, shape index: {}]  }
   0x1   :  { %13 = vsyncpa [#allocation5], 0  ;;  %s39_s26 = sshll.u32 %s5124_s5, 4  ;;  %s4799_s27 = smov [#allocation4]   ;;  %s40_s26 = int_to_ptr.hbm [resolvable:$true] %s39_s26 }
   0x2   :  { %s41_s28 = sshll.u32 %s4799_s27, 4  ;;  %s20_s8 = sshll.u32 %s5120_s1, 4  ;;  %s42_s28 = int_to_ptr.vmem [resolvable:$true] %s41_s28  ;;  %s21_s8 = int_to_ptr.hbm [resolvable:$true] %s20_s8 }
   0x3   :  { %s4800_s9 = smov 64   ;;  %s4801_s10 = smov 4  }
   0x4   :  { %47 = dma.hbm_to_vmem [thread:$0]  %s40_s26, 6144, %s42_s28, [#allocation5], %s4800_s9, %s4800_s9, %s4801_s10  }
   0x5   :  { %s4802_s11 = smov [#allocation2]   ;;  %s4803_s13 = smov 384  }
   0x6   :  { %s22_s12 = sshll.u32 %s4802_s11, 4  ;;  %s4804_s14 = smov 24   ;;  %s23_s12 = int_to_ptr.vmem [resolvable:$true] %s22_s12 }
   0x7   :  { %28 = dma.hbm_to_vmem [thread:$0]  %s21_s8, 36864, %s23_s12, [#allocation3], %s4803_s13, %s4803_s13, %s4804_s14  }
   0x8   :  { %s53_s16 = sshll.u32 %s5125_s6, 4  ;;  %s4805_s17 = smov [#allocation6]   ;;  %s54_s16 = int_to_ptr.hbm [resolvable:$true] %s53_s16 }
   0x9   :  { %s55_s18 = sshll.u32 %s4805_s17, 4  ;;  %s56_s18 = int_to_ptr.vmem [resolvable:$true] %s55_s18 }
   0xa   :  { %58 = dma.hbm_to_vmem [thread:$0]  %s54_s16, 16, %s56_s18, [#allocation5]  }
   0xb   :  { %4795 = dma.done.wait [#allocation3], 36864  }
   0xc   :  { %4796 = vsyncadd [#allocation3], 4294930432 }
   0xd   :  { %4797 = dma.done.wait [#allocation5], 6160  }
   0xe   :  { %4798 = vsyncadd [#allocation5], 4294961136  ;;  %v3169_v0 = vld [vmem:[#allocation2 + $0x150] sm:$0xf]  ;;  %v4394_v1 = vld [vmem:[#allocation2 + $0x164] sm:$0xf0] }
   0xf   :  { %v3361_v2 = vld [vmem:[#allocation2 + $0x2d0] sm:$0xf]  ;;  %v3170_v3 = vor.u32 %v4394_v1, %v3169_v0  ;;  %v4442_v4 = vld [vmem:[#allocation2 + $0x2e4] sm:$0xf0]  ;;  %v3145_v11 = vld [vmem:[#allocation2 + $0x120] sm:$0xf] }
  0x10   :  { %v3553_v5 = vld [vmem:[#allocation2 + $0x450] sm:$0xf]  ;;  %v4490_v6 = vld [vmem:[#allocation2 + $0x464] sm:$0xf0]  ;;  %v3362_v7 = vor.u32 %v4442_v4, %v3361_v2  ;;  %v4388_v13 = vld [vmem:[#allocation2 + $0x134] sm:$0xf0] }
  0x11   :  { %v3554_v8 = vor.u32 %v4490_v6, %v3553_v5  ;;  %v3745_v9 = vld [vmem:[#allocation2 + $0x5d0] sm:$0xf]  ;;  %v4538_v10 = vld [vmem:[#allocation2 + $0x5e4] sm:$0xf0]  ;;  %1837 = vmatpush.bf16.msra.mxu0 %v3170_v3  ;;  %v3337_v14 = vld [vmem:[#allocation2 + $0x2a0] sm:$0xf]  ;;  %v3146_v16 = vor.u32 %v4388_v13, %v3145_v11 }
  0x12   :  { %v3746_v12 = vor.u32 %v4538_v10, %v3745_v9  ;;  %v4436_v15 = vld [vmem:[#allocation2 + $0x2b4] sm:$0xf0]  ;;  %1850 = vmatpush.bf16.msra.mxu1 %v3362_v7  ;;  %v3529_v18 = vld [vmem:[#allocation2 + $0x420] sm:$0xf]  ;;  %v3121_v23 = vld [vmem:[#allocation2 + $0xf0] sm:$0xf] }
  0x13   :  { %1863 = vmatpush.bf16.msra.mxu2 %v3554_v8  ;;  %v3338_v17 = vor.u32 %v4436_v15, %v3337_v14  ;;  %v4484_v19 = vld [vmem:[#allocation2 + $0x434] sm:$0xf0]  ;;  %v3721_v20 = vld [vmem:[#allocation2 + $0x5a0] sm:$0xf]  ;;  %v4382_v24 = vld [vmem:[#allocation2 + $0x104] sm:$0xf0] }
  0x14   :  { %1876 = vmatpush.bf16.msra.mxu3 %v3746_v12  ;;  %v3530_v21 = vor.u32 %v4484_v19, %v3529_v18  ;;  %v4532_v22 = vld [vmem:[#allocation2 + $0x5b4] sm:$0xf0]  ;;  %v3313_v26 = vld [vmem:[#allocation2 + $0x270] sm:$0xf]  ;;  %v4430_v27 = vld [vmem:[#allocation2 + $0x284] sm:$0xf0]  ;;  %v3122_v29 = vor.u32 %v4382_v24, %v3121_v23 }
  0x15   :  { %v3722_v25 = vor.u32 %v4532_v22, %v3721_v20  ;;  %v3505_v28 = vld [vmem:[#allocation2 + $0x3f0] sm:$0xf]  ;;  %1838 = vmatpush.bf16.msra.mxu0 %v3146_v16  ;;  %v4478_v30 = vld [vmem:[#allocation2 + $0x404] sm:$0xf0]  ;;  %v3314_v33 = vor.u32 %v4430_v27, %v3313_v26  ;;  %v3097_v35 = vld [vmem:[#allocation2 + $0xc0] sm:$0xf] }
  0x16   :  { %v3697_v31 = vld [vmem:[#allocation2 + $0x570] sm:$0xf]  ;;  %v4526_v32 = vld [vmem:[#allocation2 + $0x584] sm:$0xf0]  ;;  %1851 = vmatpush.bf16.msra.mxu1 %v3338_v17  ;;  %v3506_v34 = vor.u32 %v4478_v30, %v3505_v28  ;;  %v4376_v36 = vld [vmem:[#allocation2 + $0xd4] sm:$0xf0] }
  0x17   :  { %1864 = vmatpush.bf16.msra.mxu2 %v3530_v21  ;;  %v3289_v37 = vld [vmem:[#allocation2 + $0x240] sm:$0xf]  ;;  %v3698_v38 = vor.u32 %v4526_v32, %v3697_v31  ;;  %v4424_v39 = vld [vmem:[#allocation2 + $0x254] sm:$0xf0]  ;;  %v3098_v44 = vor.u32 %v4376_v36, %v3097_v35  ;;  %v3073_v47 = vld [vmem:[#allocation2 + $0x90] sm:$0xf] }
  0x18   :  { %1877 = vmatpush.bf16.msra.mxu3 %v3722_v25  ;;  %v3481_v40 = vld [vmem:[#allocation2 + $0x3c0] sm:$0xf]  ;;  %v4472_v41 = vld [vmem:[#allocation2 + $0x3d4] sm:$0xf0]  ;;  %v3290_v45 = vor.u32 %v4424_v39, %v3289_v37  ;;  %v4370_v48 = vld [vmem:[#allocation2 + $0xa4] sm:$0xf0] }
  0x19   :  { %v3673_v42 = vld [vmem:[#allocation2 + $0x540] sm:$0xf]  ;;  %v4520_v43 = vld [vmem:[#allocation2 + $0x554] sm:$0xf0]  ;;  %1839 = vmatpush.bf16.msra.mxu0 %v3122_v29  ;;  %v3482_v46 = vor.u32 %v4472_v41, %v3481_v40  ;;  %v3265_v49 = vld [vmem:[#allocation2 + $0x210] sm:$0xf]  ;;  %v3074_v56 = vor.u32 %v4370_v48, %v3073_v47 }
  0x1a   :  { %1852 = vmatpush.bf16.msra.mxu1 %v3314_v33  ;;  %v3674_v50 = vor.u32 %v4520_v43, %v3673_v42  ;;  %v4418_v51 = vld [vmem:[#allocation2 + $0x224] sm:$0xf0]  ;;  %v3457_v52 = vld [vmem:[#allocation2 + $0x390] sm:$0xf]  ;;  %v3049_v59 = vld [vmem:[#allocation2 + $0x60] sm:$0xf] }
  0x1b   :  { %1865 = vmatpush.bf16.msra.mxu2 %v3506_v34  ;;  %v4466_v53 = vld [vmem:[#allocation2 + $0x3a4] sm:$0xf0]  ;;  %v3649_v54 = vld [vmem:[#allocation2 + $0x510] sm:$0xf]  ;;  %v3266_v57 = vor.u32 %v4418_v51, %v3265_v49  ;;  %v4364_v60 = vld [vmem:[#allocation2 + $0x74] sm:$0xf0] }
  0x1c   :  { %1878 = vmatpush.bf16.msra.mxu3 %v3698_v38  ;;  %v4514_v55 = vld [vmem:[#allocation2 + $0x524] sm:$0xf0]  ;;  %v3458_v58 = vor.u32 %v4466_v53, %v3457_v52  ;;  %v3241_v61 = vld [vmem:[#allocation2 + $0x1e0] sm:$0xf]  ;;  %v4412_v63 = vld [vmem:[#allocation2 + $0x1f4] sm:$0xf0]  ;;  %v3050_v4 = vor.u32 %v4364_v60, %v3049_v59 }
  0x1d   :  { %1840 = vmatpush.bf16.msra.mxu0 %v3098_v44  ;;  %v3650_v62 = vor.u32 %v4514_v55, %v3649_v54  ;;  %v3433_v0 = vld [vmem:[#allocation2 + $0x360] sm:$0xf]  ;;  %v4460_v1 = vld [vmem:[#allocation2 + $0x374] sm:$0xf0]  ;;  %v3242_v5 = vor.u32 %v4412_v63, %v3241_v61  ;;  %v3025_v7 = vld [vmem:[#allocation2 + $0x30] sm:$0xf] }
  0x1e   :  { %1853 = vmatpush.bf16.msra.mxu1 %v3290_v45  ;;  %v3625_v2 = vld [vmem:[#allocation2 + $0x4e0] sm:$0xf]  ;;  %v4508_v3 = vld [vmem:[#allocation2 + $0x4f4] sm:$0xf0]  ;;  %v3434_v6 = vor.u32 %v4460_v1, %v3433_v0  ;;  %v4358_v8 = vld [vmem:[#allocation2 + $0x44] sm:$0xf0] }
  0x1f   :  { %1866 = vmatpush.bf16.msra.mxu2 %v3482_v46  ;;  %v3217_v9 = vld [vmem:[#allocation2 + $0x1b0] sm:$0xf]  ;;  %v3626_v10 = vor.u32 %v4508_v3, %v3625_v2  ;;  %v4406_v11 = vld [vmem:[#allocation2 + $0x1c4] sm:$0xf0]  ;;  %v3026_v16 = vor.u32 %v4358_v8, %v3025_v7  ;;  %v3001_v17 = vld [vmem:[#allocation2] sm:$0xf] }
  0x20   :  { %1879 = vmatpush.bf16.msra.mxu3 %v3674_v50  ;;  %v3409_v12 = vld [vmem:[#allocation2 + $0x330] sm:$0xf]  ;;  %v4454_v13 = vld [vmem:[#allocation2 + $0x344] sm:$0xf0]  ;;  %v4352_v18 = vld [vmem:[#allocation2 + $0x14] sm:$0xf0]  ;;  %v3218_v19 = vor.u32 %v4406_v11, %v3217_v9 }
  0x21   :  { %1841 = vmatpush.bf16.msra.mxu0 %v3074_v56  ;;  %v3601_v14 = vld [vmem:[#allocation2 + $0x4b0] sm:$0xf]  ;;  %v4502_v15 = vld [vmem:[#allocation2 + $0x4c4] sm:$0xf0]  ;;  %v3410_v20 = vor.u32 %v4454_v13, %v3409_v12  ;;  %v3193_v21 = vld [vmem:[#allocation2 + $0x180] sm:$0xf]  ;;  %v3002_v31 = vor.u32 %v4352_v18, %v3001_v17 }
  0x22   :  { %1854 = vmatpush.bf16.msra.mxu1 %v3266_v57  ;;  %v4400_v22 = vld [vmem:[#allocation2 + $0x194] sm:$0xf0]  ;;  %v3385_v23 = vld [vmem:[#allocation2 + $0x300] sm:$0xf]  ;;  %v3602_v24 = vor.u32 %v4502_v15, %v3601_v14  ;;  %v3937_v28 = vld [vmem:[#allocation2 + $0x750] sm:$0xf] }
  0x23   :  { %1867 = vmatpush.bf16.msra.mxu2 %v3458_v58  ;;  %v4448_v25 = vld [vmem:[#allocation2 + $0x314] sm:$0xf0]  ;;  %v3577_v26 = vld [vmem:[#allocation2 + $0x480] sm:$0xf]  ;;  %v4586_v29 = vld [vmem:[#allocation2 + $0x764] sm:$0xf0]  ;;  %v3194_v35 = vor.u32 %v4400_v22, %v3193_v21 }
  0x24   :  { %1880 = vmatpush.bf16.msra.mxu3 %v3650_v62  ;;  %v4496_v27 = vld [vmem:[#allocation2 + $0x494] sm:$0xf0]  ;;  %v4129_v30 = vld [vmem:[#allocation2 + $0x8d0] sm:$0xf]  ;;  %v4634_v32 = vld [vmem:[#allocation2 + $0x8e4] sm:$0xf0]  ;;  %v3386_v36 = vor.u32 %v4448_v25, %v3385_v23  ;;  %v3938_v40 = vor.u32 %v4586_v29, %v3937_v28 }
  0x25   :  { %1842 = vmatpush.bf16.msra.mxu0 %v3050_v4  ;;  %v4391_v33 = vld [vmem:[#allocation2 + $0x154] sm:$0xf]  ;;  %v3171_v34 = vld [vmem:[#allocation2 + $0x168] sm:$0xf0]  ;;  %v3578_v39 = vor.u32 %v4496_v27, %v3577_v26  ;;  %v4130_v41 = vor.u32 %v4634_v32, %v4129_v30  ;;  %v3913_v43 = vld [vmem:[#allocation2 + $0x720] sm:$0xf] }
  0x26   :  { %1855 = vmatpush.bf16.msra.mxu1 %v3242_v5  ;;  %v4439_v37 = vld [vmem:[#allocation2 + $0x2d4] sm:$0xf]  ;;  %v3363_v38 = vld [vmem:[#allocation2 + $0x2e8] sm:$0xf0]  ;;  %v3174_v42 = vor.u32 %v4391_v33, %v3171_v34  ;;  %v4580_v44 = vld [vmem:[#allocation2 + $0x734] sm:$0xf0] }
  0x27   :  { %1868 = vmatpush.bf16.msra.mxu2 %v3434_v6  ;;  %v4105_v45 = vld [vmem:[#allocation2 + $0x8a0] sm:$0xf]  ;;  %v3366_v46 = vor.u32 %v4439_v37, %v3363_v38  ;;  %v4628_v47 = vld [vmem:[#allocation2 + $0x8b4] sm:$0xf0]  ;;  %v4385_v48 = vld [vmem:[#allocation2 + $0x124] sm:$0xf]  ;;  %v3914_v53 = vor.u32 %v4580_v44, %v3913_v43 }
  0x28   :  { %1881 = vmatpush.bf16.msra.mxu3 %v3626_v10  ;;  %v3147_v49 = vld [vmem:[#allocation2 + $0x138] sm:$0xf0]  ;;  %v4433_v50 = vld [vmem:[#allocation2 + $0x2a4] sm:$0xf]  ;;  %v4106_v56 = vor.u32 %v4628_v47, %v4105_v45  ;;  %v3889_v58 = vld [vmem:[#allocation2 + $0x6f0] sm:$0xf] }
  0x29   :  { %1843 = vmatpush.bf16.msra.mxu0 %v3026_v16  ;;  %v3339_v51 = vld [vmem:[#allocation2 + $0x2b8] sm:$0xf0]  ;;  %v71_v52 = vld [vmem:[%s5119_s0] sm:$0xff]  ;;  %v3150_v57 = vor.u32 %v4385_v48, %v3147_v49  ;;  %v4574_v59 = vld [vmem:[#allocation2 + $0x704] sm:$0xf0] }
  0x2a   :  { %1856 = vmatpush.bf16.msra.mxu1 %v3218_v19  ;;  %v379_v54 = vunpack.c.l.b16 %v71_v52  ;;  %v380_v55 = vunpack.c.h.b16 %v71_v52  ;;  %v4081_v60 = vld [vmem:[#allocation2 + $0x870] sm:$0xf]  ;;  %v3342_v61 = vor.u32 %v4433_v50, %v3339_v51  ;;  %v4622_v62 = vld [vmem:[#allocation2 + $0x884] sm:$0xf0]  ;;  %v4379_v63 = vld [vmem:[#allocation2 + $0xf4] sm:$0xf]  ;;  %v3890_v5 = vor.u32 %v4574_v59, %v3889_v58 }
  0x2b   :  { %1869 = vmatpush.bf16.msra.mxu2 %v3410_v20  ;;  %v3123_v0 = vld [vmem:[#allocation2 + $0x108] sm:$0xf0]  ;;  %v4427_v3 = vld [vmem:[#allocation2 + $0x274] sm:$0xf]  ;;  %v4082_v7 = vor.u32 %v4622_v62, %v4081_v60  ;;  %v3865_v9 = vld [vmem:[#allocation2 + $0x6c0] sm:$0xf] }
  0x2c   :  { %1882 = vmatpush.bf16.msra.mxu3 %v3602_v24  ;;  %v4859_v1 = vpack.c.b16 %v379_v54, %v379_v54  ;;  %v4861_v2 = vpack.c.b16 %v380_v55, %v380_v55  ;;  %v3315_v4 = vld [vmem:[#allocation2 + $0x288] sm:$0xf0]  ;;  %v3126_v8 = vor.u32 %v4379_v63, %v3123_v0  ;;  %v4568_v10 = vld [vmem:[#allocation2 + $0x6d4] sm:$0xf0]  ;;  %v4057_v11 = vld [vmem:[#allocation2 + $0x840] sm:$0xf] }
  0x2d   :  { %1844 = vmatpush.bf16.msra.mxu0 %v3002_v31  ;;  %v72_v6 = vld [vmem:[%s5119_s0 + $0x8] sm:$0xff]  ;;  %v3318_v14 = vor.u32 %v4427_v3, %v3315_v4  ;;  %v4616_v15 = vld [vmem:[#allocation2 + $0x854] sm:$0xf0]  ;;  %v4373_v16 = vld [vmem:[#allocation2 + $0xc4] sm:$0xf]  ;;  %v3866_v22 = vor.u32 %v4568_v10, %v3865_v9 }
  0x2e   :  { %1857 = vmatpush.bf16.msra.mxu1 %v3194_v35  ;;  %v381_v12 = vunpack.c.l.b16 %v72_v6  ;;  %v382_v13 = vunpack.c.h.b16 %v72_v6  ;;  %v3099_v17 = vld [vmem:[#allocation2 + $0xd8] sm:$0xf0]  ;;  %v4421_v18 = vld [vmem:[#allocation2 + $0x244] sm:$0xf]  ;;  %v4058_v23 = vor.u32 %v4616_v15, %v4057_v11  ;;  %v3841_v25 = vld [vmem:[#allocation2 + $0x690] sm:$0xf] }
  0x2f   :  { %1870 = vmatpush.bf16.msra.mxu2 %v3386_v36  ;;  %v3291_v19 = vld [vmem:[#allocation2 + $0x258] sm:$0xf0]  ;;  %v3102_v24 = vor.u32 %v4373_v16, %v3099_v17  ;;  %v4562_v26 = vld [vmem:[#allocation2 + $0x6a4] sm:$0xf0]  ;;  %v4033_v27 = vld [vmem:[#allocation2 + $0x810] sm:$0xf] }
  0x30   :  { %1883 = vmatpush.bf16.msra.mxu3 %v3578_v39  ;;  %1845 = vmatmul.bf16.vlgmr.msra.gmra.mxu0 %v4859_v1  ;;  %v4868_v20 = vpack.c.b16 %v381_v12, %v381_v12  ;;  %v4870_v21 = vpack.c.b16 %v382_v13, %v382_v13  ;;  %v3294_v28 = vor.u32 %v4421_v18, %v3291_v19  ;;  %v4610_v29 = vld [vmem:[#allocation2 + $0x824] sm:$0xf0]  ;;  %v4367_v30 = vld [vmem:[#allocation2 + $0x94] sm:$0xf]  ;;  %v3075_v31 = vld [vmem:[#allocation2 + $0xa8] sm:$0xf0] }
  0x31   :  { %1889 = vmatpush.bf16.msrb.mxu0 %v3938_v40  ;;  %1858 = vmatmul.bf16.vlgmr.msra.gmra.mxu1 %v4861_v2  ;;  %v4415_v32 = vld [vmem:[#allocation2 + $0x214] sm:$0xf]  ;;  %v3267_v33 = vld [vmem:[#allocation2 + $0x228] sm:$0xf0]  ;;  %v3842_v34 = vor.u32 %v4562_v26, %v3841_v25  ;;  %v4034_v35 = vor.u32 %v4610_v29, %v4033_v27  ;;  %v3078_v36 = vor.u32 %v4367_v30, %v3075_v31  ;;  %v3817_v37 = vld [vmem:[#allocation2 + $0x660] sm:$0xf] }
  0x32   :  { %1902 = vmatpush.bf16.msrb.mxu1 %v4130_v41  ;;  %1871 = vmatmul.bf16.vlgmr.msra.gmra.mxu2 %v4868_v20  ;;  %v4556_v38 = vld [vmem:[#allocation2 + $0x674] sm:$0xf0]  ;;  %v4009_v39 = vld [vmem:[#allocation2 + $0x7e0] sm:$0xf]  ;;  %v3270_v40 = vor.u32 %v4415_v32, %v3267_v33  ;;  %v3051_v43 = vld [vmem:[#allocation2 + $0x78] sm:$0xf0] }
  0x33   :  { %1915 = vmatpush.bf16.msrb.mxu2 %v3174_v42  ;;  %1884 = vmatmul.bf16.vlgmr.msra.gmra.mxu3 %v4870_v21  ;;  %v4604_v41 = vld [vmem:[#allocation2 + $0x7f4] sm:$0xf0]  ;;  %v4361_v42 = vld [vmem:[#allocation2 + $0x64] sm:$0xf]  ;;  %v3243_v45 = vld [vmem:[#allocation2 + $0x1f8] sm:$0xf0] }
  0x34   :  { %1928 = vmatpush.bf16.msrb.mxu3 %v3366_v46  ;;  %v4409_v44 = vld [vmem:[#allocation2 + $0x1e4] sm:$0xf]  ;;  %v3818_v46 = vor.u32 %v4556_v38, %v3817_v37  ;;  %v4010_v47 = vor.u32 %v4604_v41, %v4009_v39  ;;  %v3054_v48 = vor.u32 %v4361_v42, %v3051_v43  ;;  %v3793_v49 = vld [vmem:[#allocation2 + $0x630] sm:$0xf]  ;;  %v4550_v50 = vld [vmem:[#allocation2 + $0x644] sm:$0xf0] }
  0x35   :  { %1890 = vmatpush.bf16.msrb.mxu0 %v3914_v53  ;;  %v3985_v51 = vld [vmem:[#allocation2 + $0x7b0] sm:$0xf]  ;;  %v3246_v52 = vor.u32 %v4409_v44, %v3243_v45  ;;  %v4598_v53 = vld [vmem:[#allocation2 + $0x7c4] sm:$0xf0]  ;;  %v4355_v54 = vld [vmem:[#allocation2 + $0x34] sm:$0xf]  ;;  %v3794_v58 = vor.u32 %v4550_v50, %v3793_v49 }
  0x36   :  { %1903 = vmatpush.bf16.msrb.mxu1 %v4106_v56  ;;  %v3027_v55 = vld [vmem:[#allocation2 + $0x48] sm:$0xf0]  ;;  %v4403_v56 = vld [vmem:[#allocation2 + $0x1b4] sm:$0xf]  ;;  %v3769_v59 = vld [vmem:[#allocation2 + $0x600] sm:$0xf]  ;;  %v3986_v62 = vor.u32 %v4598_v53, %v3985_v51 }
  0x37   :  { %1916 = vmatpush.bf16.msrb.mxu2 %v3150_v57  ;;  %v3219_v57 = vld [vmem:[#allocation2 + $0x1c8] sm:$0xf0]  ;;  %v4544_v60 = vld [vmem:[#allocation2 + $0x614] sm:$0xf0]  ;;  %v3030_v63 = vor.u32 %v4355_v54, %v3027_v55  ;;  %v4349_v3 = vld [vmem:[#allocation2 + $0x4] sm:$0xf] }
  0x38   :  { %1929 = vmatpush.bf16.msrb.mxu3 %v3342_v61  ;;  %v3961_v61 = vld [vmem:[#allocation2 + $0x780] sm:$0xf]  ;;  %v4592_v0 = vld [vmem:[#allocation2 + $0x794] sm:$0xf0]  ;;  %v73_v4 = vld [vmem:[%s5119_s0 + $0x10] sm:$0xff]  ;;  %v3770_v12 = vor.u32 %v4544_v60, %v3769_v59 }
  0x39   :  { %1891 = vmatpush.bf16.msrb.mxu0 %v3890_v5  ;;  %v3222_v5 = vor.u32 %v4403_v56, %v3219_v57  ;;  %v3003_v6 = vld [vmem:[#allocation2 + $0x18] sm:$0xf0]  ;;  %v4487_v9 = vld [vmem:[#allocation2 + $0x454] sm:$0xf]  ;;  %v3555_v10 = vld [vmem:[#allocation2 + $0x468] sm:$0xf0]  ;;  %v383_v16 = vunpack.c.l.b16 %v73_v4  ;;  %v3962_v17 = vor.u32 %v4592_v0, %v3961_v61 }
  0x3a   :  { %1904 = vmatpush.bf16.msrb.mxu1 %v4082_v7  ;;  %v4397_v7 = vld [vmem:[#allocation2 + $0x184] sm:$0xf]  ;;  %v4535_v11 = vld [vmem:[#allocation2 + $0x5d4] sm:$0xf]  ;;  %v3747_v13 = vld [vmem:[#allocation2 + $0x5e8] sm:$0xf0]  ;;  %v3006_v18 = vor.u32 %v4349_v3, %v3003_v6  ;;  %v3558_v25 = vor.u32 %v4487_v9, %v3555_v10 }
  0x3b   :  { %1917 = vmatpush.bf16.msrb.mxu2 %v3126_v8  ;;  %v3195_v8 = vld [vmem:[#allocation2 + $0x198] sm:$0xf0]  ;;  %v3939_v15 = vld [vmem:[#allocation2 + $0x768] sm:$0xf0]  ;;  %v4631_v19 = vld [vmem:[#allocation2 + $0x8d4] sm:$0xf]  ;;  %v3750_v26 = vor.u32 %v4535_v11, %v3747_v13  ;;  %v4877_v32 = vpack.c.b16 %v383_v16, %v383_v16 }
  0x3c   :  { %1930 = vmatpush.bf16.msrb.mxu3 %v3318_v14  ;;  %v4583_v14 = vld [vmem:[#allocation2 + $0x754] sm:$0xf]  ;;  %v3531_v29 = vld [vmem:[#allocation2 + $0x438] sm:$0xf0]  ;;  %v4529_v30 = vld [vmem:[#allocation2 + $0x5a4] sm:$0xf] }
  0x3d   :  { %1892 = vmatpush.bf16.msrb.mxu0 %v3866_v22  ;;  %v4131_v22 = vld [vmem:[#allocation2 + $0x8e8] sm:$0xf0]  ;;  %v3942_v27 = vor.u32 %v4583_v14, %v3939_v15  ;;  %v3723_v33 = vld [vmem:[#allocation2 + $0x5b8] sm:$0xf0]  ;;  %v4625_v37 = vld [vmem:[#allocation2 + $0x8a4] sm:$0xf] }
  0x3e   :  { %1905 = vmatpush.bf16.msrb.mxu1 %v4058_v23  ;;  %v384_v23 = vunpack.c.h.b16 %v73_v4  ;;  %v4134_v31 = vor.u32 %v4631_v19, %v4131_v22  ;;  %v4107_v38 = vld [vmem:[#allocation2 + $0x8b8] sm:$0xf0]  ;;  %v4475_v42 = vld [vmem:[#allocation2 + $0x3f4] sm:$0xf]  ;;  %v3507_v43 = vld [vmem:[#allocation2 + $0x408] sm:$0xf0] }
  0x3f   :  { %1918 = vmatpush.bf16.msrb.mxu2 %v3102_v24  ;;  %v3198_v24 = vor.u32 %v4397_v7, %v3195_v8  ;;  %v4523_v44 = vld [vmem:[#allocation2 + $0x574] sm:$0xf]  ;;  %v4110_v45 = vor.u32 %v4625_v37, %v4107_v38  ;;  %v4083_v50 = vld [vmem:[#allocation2 + $0x888] sm:$0xf0]  ;;  %v3510_v51 = vor.u32 %v4475_v42, %v3507_v43  ;;  %v4469_v54 = vld [vmem:[#allocation2 + $0x3c4] sm:$0xf] }
  0x40   :  { %1931 = vmatpush.bf16.msrb.mxu3 %v3294_v28  ;;  %v4481_v28 = vld [vmem:[#allocation2 + $0x424] sm:$0xf]  ;;  %v4619_v49 = vld [vmem:[#allocation2 + $0x874] sm:$0xf]  ;;  %v3483_v55 = vld [vmem:[#allocation2 + $0x3d8] sm:$0xf0] }
  0x41   :  { %1893 = vmatpush.bf16.msrb.mxu0 %v3842_v34  ;;  %v4577_v34 = vld [vmem:[#allocation2 + $0x724] sm:$0xf]  ;;  %v3534_v39 = vor.u32 %v4481_v28, %v3531_v29  ;;  %v4086_v57 = vor.u32 %v4619_v49, %v4083_v50  ;;  %v3867_v60 = vld [vmem:[#allocation2 + $0x6d8] sm:$0xf0]  ;;  %v4463_v4 = vld [vmem:[#allocation2 + $0x394] sm:$0xf] }
  0x42   :  { %1906 = vmatpush.bf16.msrb.mxu1 %v4034_v35  ;;  %v3915_v35 = vld [vmem:[#allocation2 + $0x738] sm:$0xf0]  ;;  %v4517_v56 = vld [vmem:[#allocation2 + $0x544] sm:$0xf]  ;;  %v4511_v6 = vld [vmem:[#allocation2 + $0x514] sm:$0xf] }
  0x43   :  { %1919 = vmatpush.bf16.msrb.mxu2 %v3078_v36  ;;  %v4879_v36 = vpack.c.b16 %v384_v23, %v384_v23  ;;  %v3918_v41 = vor.u32 %v4577_v34, %v3915_v35  ;;  %v4565_v59 = vld [vmem:[#allocation2 + $0x6c4] sm:$0xf]  ;;  %v3651_v8 = vld [vmem:[#allocation2 + $0x528] sm:$0xf0]  ;;  %v4559_v9 = vld [vmem:[#allocation2 + $0x694] sm:$0xf] }
  0x44   :  { %1932 = vmatpush.bf16.msrb.mxu3 %v3270_v40  ;;  %v3726_v40 = vor.u32 %v4529_v30, %v3723_v33  ;;  %v4613_v61 = vld [vmem:[#allocation2 + $0x844] sm:$0xf]  ;;  %v3870_v3 = vor.u32 %v4565_v59, %v3867_v60  ;;  %v3843_v10 = vld [vmem:[#allocation2 + $0x6a8] sm:$0xf0]  ;;  %v4607_v11 = vld [vmem:[#allocation2 + $0x814] sm:$0xf]  ;;  %v3654_v14 = vor.u32 %v4511_v6, %v3651_v8 }
  0x45   :  { %1894 = vmatpush.bf16.msrb.mxu0 %v3818_v46  ;;  %v3699_v46 = vld [vmem:[#allocation2 + $0x588] sm:$0xf0]  ;;  %v3846_v15 = vor.u32 %v4559_v9, %v3843_v10  ;;  %v4457_v16 = vld [vmem:[#allocation2 + $0x364] sm:$0xf]  ;;  %v3627_v22 = vld [vmem:[#allocation2 + $0x4f8] sm:$0xf0] }
  0x46   :  { %1907 = vmatpush.bf16.msrb.mxu1 %v4010_v47  ;;  %v4571_v47 = vld [vmem:[#allocation2 + $0x6f4] sm:$0xf]  ;;  %v4553_v23 = vld [vmem:[#allocation2 + $0x664] sm:$0xf]  ;;  %v3603_v35 = vld [vmem:[#allocation2 + $0x4c8] sm:$0xf0] }
  0x47   :  { %1920 = vmatpush.bf16.msrb.mxu2 %v3054_v48  ;;  %v3891_v48 = vld [vmem:[#allocation2 + $0x708] sm:$0xf0]  ;;  %v4451_v30 = vld [vmem:[#allocation2 + $0x334] sm:$0xf]  ;;  %v4445_v42 = vld [vmem:[#allocation2 + $0x304] sm:$0xf] }
  0x48   :  { %1933 = vmatpush.bf16.msrb.mxu3 %v3246_v52  ;;  %v3702_v52 = vor.u32 %v4523_v44, %v3699_v46  ;;  %v3894_v53 = vor.u32 %v4571_v47, %v3891_v48  ;;  %v4499_v33 = vld [vmem:[#allocation2 + $0x4b4] sm:$0xf]  ;;  %v3795_v38 = vld [vmem:[#allocation2 + $0x648] sm:$0xf0]  ;;  %v3387_v43 = vld [vmem:[#allocation2 + $0x318] sm:$0xf0] }
  0x49   :  { %1895 = vmatpush.bf16.msrb.mxu0 %v3794_v58  ;;  %v3675_v58 = vld [vmem:[#allocation2 + $0x558] sm:$0xf0]  ;;  %v4547_v37 = vld [vmem:[#allocation2 + $0x634] sm:$0xf]  ;;  %v3606_v44 = vor.u32 %v4499_v33, %v3603_v35  ;;  %v4493_v46 = vld [vmem:[#allocation2 + $0x484] sm:$0xf] }
  0x4a   :  { %1908 = vmatpush.bf16.msrb.mxu1 %v3986_v62  ;;  %v4059_v62 = vld [vmem:[#allocation2 + $0x858] sm:$0xf0]  ;;  %v3678_v0 = vor.u32 %v4517_v56, %v3675_v58  ;;  %v4541_v48 = vld [vmem:[#allocation2 + $0x604] sm:$0xf]  ;;  %v3390_v56 = vor.u32 %v4445_v42, %v3387_v43  ;;  %v3561_v58 = vld [vmem:[#allocation2 + $0x458] sm:$0xf] }
  0x4b   :  { %1921 = vmatpush.bf16.msrb.mxu2 %v3030_v63  ;;  %v3486_v63 = vor.u32 %v4469_v54, %v3483_v55  ;;  %v4062_v7 = vor.u32 %v4613_v61, %v4059_v62  ;;  %v3579_v47 = vld [vmem:[#allocation2 + $0x498] sm:$0xf0]  ;;  %v4395_v54 = vld [vmem:[#allocation2 + $0x16c] sm:$0xf0]  ;;  %v3369_v55 = vld [vmem:[#allocation2 + $0x2d8] sm:$0xf] }
  0x4c   :  { %1934 = vmatpush.bf16.msrb.mxu3 %v3222_v5  ;;  %v3459_v5 = vld [vmem:[#allocation2 + $0x3a8] sm:$0xf0]  ;;  %v3771_v50 = vld [vmem:[#allocation2 + $0x618] sm:$0xf0]  ;;  %v4491_v59 = vld [vmem:[#allocation2 + $0x46c] sm:$0xf0]  ;;  %v3582_v60 = vor.u32 %v4493_v46, %v3579_v47 }
  0x4d   :  { %1896 = vmatpush.bf16.msrb.mxu0 %v3770_v12  ;;  %v4035_v12 = vld [vmem:[#allocation2 + $0x828] sm:$0xf0]  ;;  %v3462_v13 = vor.u32 %v4463_v4, %v3459_v5  ;;  %v3774_v61 = vor.u32 %v4541_v48, %v3771_v50  ;;  %v3753_v62 = vld [vmem:[#allocation2 + $0x5d8] sm:$0xf]  ;;  %v3562_v5 = vor.u32 %v4491_v59, %v3561_v58  ;;  %v3153_v6 = vld [vmem:[#allocation2 + $0x128] sm:$0xf] }
  0x4e   :  { %1909 = vmatpush.bf16.msrb.mxu1 %v3962_v17  ;;  %v3435_v17 = vld [vmem:[#allocation2 + $0x378] sm:$0xf0]  ;;  %v4038_v19 = vor.u32 %v4607_v11, %v4035_v12  ;;  %v3345_v8 = vld [vmem:[#allocation2 + $0x2a8] sm:$0xf]  ;;  %v4437_v10 = vld [vmem:[#allocation2 + $0x2bc] sm:$0xf0] }
  0x4f   :  { %1922 = vmatpush.bf16.msrb.mxu2 %v3006_v18  ;;  %v4505_v18 = vld [vmem:[#allocation2 + $0x4e4] sm:$0xf]  ;;  %v3537_v11 = vld [vmem:[#allocation2 + $0x428] sm:$0xf]  ;;  %v4485_v12 = vld [vmem:[#allocation2 + $0x43c] sm:$0xf0] }
  0x50   :  { %1935 = vmatpush.bf16.msrb.mxu3 %v3198_v24  ;;  %1897 = vmatmul.bf16.vlgmr.msrb.gmra.mxu0 %v4877_v32  ;;  %v3819_v24 = vld [vmem:[#allocation2 + $0x678] sm:$0xf0]  ;;  %v3630_v28 = vor.u32 %v4505_v18, %v3627_v22  ;;  %v3129_v18 = vld [vmem:[#allocation2 + $0xf8] sm:$0xf]  ;;  %v3105_v33 = vld [vmem:[#allocation2 + $0xc8] sm:$0xf] }
  0x51   :  { %1941 = vmatpush.bf16.msra.mxu0 %v3558_v25  ;;  %1910 = vmatmul.bf16.vlgmr.msrb.gmra.mxu1 %v4879_v36  ;;  %v4601_v25 = vld [vmem:[#allocation2 + $0x7e4] sm:$0xf]  ;;  %v3822_v29 = vor.u32 %v4553_v23, %v3819_v24  ;;  %v3321_v22 = vld [vmem:[#allocation2 + $0x278] sm:$0xf]  ;;  %v4431_v24 = vld [vmem:[#allocation2 + $0x28c] sm:$0xf0] }
  0x52   :  { %1954 = vmatpush.bf16.msra.mxu1 %v3750_v26  ;;  %1923 = vmatmul.bf16.vlgmr.msrb.gmra.mxu2 %v4859_v1  ;;  %v4011_v26 = vld [vmem:[#allocation2 + $0x7f8] sm:$0xf0]  ;;  %v3297_v35 = vld [vmem:[#allocation2 + $0x248] sm:$0xf]  ;;  %v4521_v42 = vld [vmem:[#allocation2 + $0x55c] sm:$0xf0] }
  0x53   :  { %1967 = vmatpush.bf16.msra.mxu2 %v3942_v27  ;;  %1936 = vmatmul.bf16.vlgmr.msrb.gmra.mxu3 %v4861_v2  ;;  %v3438_v27 = vor.u32 %v4457_v16, %v3435_v17  ;;  %v4014_v34 = vor.u32 %v4601_v25, %v4011_v26  ;;  %v3346_v16 = vor.u32 %v4437_v10, %v3345_v8  ;;  %v3513_v25 = vld [vmem:[#allocation2 + $0x3f8] sm:$0xf]  ;;  %v4479_v26 = vld [vmem:[#allocation2 + $0x40c] sm:$0xf0]  ;;  %v3057_v58 = vld [vmem:[#allocation2 + $0x68] sm:$0xf] }
  0x54   :  { %1980 = vmatpush.bf16.msra.mxu3 %v4134_v31  ;;  %v3411_v31 = vld [vmem:[#allocation2 + $0x348] sm:$0xf0]  ;;  %v3538_v17 = vor.u32 %v4485_v12, %v3537_v11  ;;  %v3081_v46 = vld [vmem:[#allocation2 + $0x98] sm:$0xf]  ;;  %v4371_v47 = vld [vmem:[#allocation2 + $0xac] sm:$0xf0] }
  0x55   :  { %1942 = vmatpush.bf16.msra.mxu0 %v3534_v39  ;;  %v4595_v39 = vld [vmem:[#allocation2 + $0x7b4] sm:$0xf]  ;;  %v3273_v48 = vld [vmem:[#allocation2 + $0x218] sm:$0xf]  ;;  %v4419_v50 = vld [vmem:[#allocation2 + $0x22c] sm:$0xf0] }
  0x56   :  { %1955 = vmatpush.bf16.msra.mxu1 %v3726_v40  ;;  %v3987_v40 = vld [vmem:[#allocation2 + $0x7c8] sm:$0xf0]  ;;  %v4365_v59 = vld [vmem:[#allocation2 + $0x7c] sm:$0xf0]  ;;  %v3033_v8 = vld [vmem:[#allocation2 + $0x38] sm:$0xf] }
  0x57   :  { %1968 = vmatpush.bf16.msra.mxu2 %v3918_v41  ;;  %v3414_v41 = vor.u32 %v4451_v30, %v3411_v31  ;;  %v3990_v49 = vor.u32 %v4595_v39, %v3987_v40  ;;  %v3322_v30 = vor.u32 %v4431_v24, %v3321_v22  ;;  %v3514_v31 = vor.u32 %v4479_v26, %v3513_v25  ;;  %v3489_v39 = vld [vmem:[#allocation2 + $0x3c8] sm:$0xf]  ;;  %v4473_v40 = vld [vmem:[#allocation2 + $0x3dc] sm:$0xf0]  ;;  %v3225_v10 = vld [vmem:[#allocation2 + $0x1b8] sm:$0xf] }
  0x58   :  { %1981 = vmatpush.bf16.msra.mxu3 %v4110_v45  ;;  %v3798_v45 = vor.u32 %v4547_v37, %v3795_v38  ;;  %v4425_v38 = vld [vmem:[#allocation2 + $0x25c] sm:$0xf0]  ;;  %v4407_v12 = vld [vmem:[#allocation2 + $0x1cc] sm:$0xf0]  ;;  %v3201_v24 = vld [vmem:[#allocation2 + $0x188] sm:$0xf] }
  0x59   :  { %1943 = vmatpush.bf16.msra.mxu0 %v3510_v51  ;;  %v4589_v51 = vld [vmem:[#allocation2 + $0x784] sm:$0xf]  ;;  %v3226_v22 = vor.u32 %v4407_v12, %v3225_v10  ;;  %v4401_v25 = vld [vmem:[#allocation2 + $0x19c] sm:$0xf0]  ;;  %v3393_v26 = vld [vmem:[#allocation2 + $0x308] sm:$0xf] }
  0x5a   :  { %1956 = vmatpush.bf16.msra.mxu1 %v3702_v52  ;;  %v3963_v52 = vld [vmem:[#allocation2 + $0x798] sm:$0xf0]  ;;  %v3873_v10 = vld [vmem:[#allocation2 + $0x6c8] sm:$0xf] }
  0x5b   :  { %1969 = vmatpush.bf16.msra.mxu2 %v3894_v53  ;;  %v3177_v53 = vld [vmem:[#allocation2 + $0x158] sm:$0xf]  ;;  %v4065_v12 = vld [vmem:[#allocation2 + $0x848] sm:$0xf] }
  0x5c   :  { %1982 = vmatpush.bf16.msra.mxu3 %v4086_v57  ;;  %v4443_v57 = vld [vmem:[#allocation2 + $0x2ec] sm:$0xf0] }
  0x5d   :  { %1944 = vmatpush.bf16.msra.mxu0 %v3486_v63  ;;  %v4539_v63 = vld [vmem:[#allocation2 + $0x5ec] sm:$0xf0]  ;;  %v3370_v4 = vor.u32 %v4443_v57, %v3369_v55  ;;  %v3082_v55 = vor.u32 %v4371_v47, %v3081_v46 }
  0x5e   :  { %1957 = vmatpush.bf16.msra.mxu1 %v3678_v0  ;;  %v3966_v0 = vor.u32 %v4589_v51, %v3963_v52  ;;  %v3754_v9 = vor.u32 %v4539_v63, %v3753_v62  ;;  %v3465_v51 = vld [vmem:[#allocation2 + $0x398] sm:$0xf]  ;;  %v4467_v52 = vld [vmem:[#allocation2 + $0x3ac] sm:$0xf0]  ;;  %v4413_v62 = vld [vmem:[#allocation2 + $0x1fc] sm:$0xf0] }
  0x5f   :  { %1970 = vmatpush.bf16.msra.mxu2 %v3870_v3  ;;  %v3178_v3 = vor.u32 %v4395_v54, %v3177_v53  ;;  %v3657_v53 = vld [vmem:[#allocation2 + $0x518] sm:$0xf]  ;;  %v4515_v54 = vld [vmem:[#allocation2 + $0x52c] sm:$0xf0]  ;;  %v3466_v57 = vor.u32 %v4467_v52, %v3465_v51  ;;  %v3441_v63 = vld [vmem:[#allocation2 + $0x368] sm:$0xf] }
  0x60   :  { %1983 = vmatpush.bf16.msra.mxu3 %v4062_v7  ;;  %v4389_v7 = vld [vmem:[#allocation2 + $0x13c] sm:$0xf0] }
  0x61   :  { %1945 = vmatpush.bf16.msra.mxu0 %v3462_v13  ;;  %v3729_v13 = vld [vmem:[#allocation2 + $0x5a8] sm:$0xf]  ;;  %v4629_v52 = vld [vmem:[#allocation2 + $0x8bc] sm:$0xf0] }
  0x62   :  { %1958 = vmatpush.bf16.msra.mxu1 %v3654_v14  ;;  %v4533_v14 = vld [vmem:[#allocation2 + $0x5bc] sm:$0xf0] }
  0x63   :  { %1971 = vmatpush.bf16.msra.mxu2 %v3846_v15  ;;  %v3154_v15 = vor.u32 %v4389_v7, %v3153_v6  ;;  %v3730_v23 = vor.u32 %v4533_v14, %v3729_v13  ;;  %v3417_v13 = vld [vmem:[#allocation2 + $0x338] sm:$0xf]  ;;  %v4455_v14 = vld [vmem:[#allocation2 + $0x34c] sm:$0xf0] }
  0x64   :  { %1984 = vmatpush.bf16.msra.mxu3 %v4038_v19  ;;  %v4383_v19 = vld [vmem:[#allocation2 + $0x10c] sm:$0xf0] }
  0x65   :  { %1946 = vmatpush.bf16.msra.mxu0 %v3438_v27  ;;  %v3705_v27 = vld [vmem:[#allocation2 + $0x578] sm:$0xf] }
  0x66   :  { %1959 = vmatpush.bf16.msra.mxu1 %v3630_v28  ;;  %v4527_v28 = vld [vmem:[#allocation2 + $0x58c] sm:$0xf0] }
  0x67   :  { %1972 = vmatpush.bf16.msra.mxu2 %v3822_v29  ;;  %v3130_v29 = vor.u32 %v4383_v19, %v3129_v18  ;;  %v3706_v37 = vor.u32 %v4527_v28, %v3705_v27  ;;  %v3009_v18 = vld [vmem:[#allocation2 + $0x8] sm:$0xf]  ;;  %v4353_v19 = vld [vmem:[#allocation2 + $0x1c] sm:$0xf0] }
  0x68   :  { %1985 = vmatpush.bf16.msra.mxu3 %v4014_v34  ;;  %v4377_v34 = vld [vmem:[#allocation2 + $0xdc] sm:$0xf0] }
  0x69   :  { %1947 = vmatpush.bf16.msra.mxu0 %v3414_v41  ;;  %v3681_v41 = vld [vmem:[#allocation2 + $0x548] sm:$0xf]  ;;  %v3106_v43 = vor.u32 %v4377_v34, %v3105_v33  ;;  %v4449_v28 = vld [vmem:[#allocation2 + $0x31c] sm:$0xf0]  ;;  %v4587_v33 = vld [vmem:[#allocation2 + $0x76c] sm:$0xf0] }
  0x6a   :  { %1960 = vmatpush.bf16.msra.mxu1 %v3606_v44  ;;  %v3298_v44 = vor.u32 %v4425_v38, %v3297_v35  ;;  %v4137_v34 = vld [vmem:[#allocation2 + $0x8d8] sm:$0xf]  ;;  %v3010_v35 = vor.u32 %v4353_v19, %v3009_v18  ;;  %v4392_v38 = vld [vmem:[#allocation2 + $0x15c] sm:$0xf]  ;;  %v3299_v18 = vld [vmem:[#allocation2 + $0x260] sm:$0xf0] }
  0x6b   :  { %1973 = vmatpush.bf16.msra.mxu2 %v3798_v45  ;;  %v3490_v45 = vor.u32 %v4473_v40, %v3489_v39  ;;  %v3179_v39 = vld [vmem:[#allocation2 + $0x170] sm:$0xf0]  ;;  %v3202_v40 = vor.u32 %v4401_v25, %v3201_v24  ;;  %v3849_v24 = vld [vmem:[#allocation2 + $0x698] sm:$0xf]  ;;  %v4563_v25 = vld [vmem:[#allocation2 + $0x6ac] sm:$0xf0] }
  0x6c   :  { %1986 = vmatpush.bf16.msra.mxu3 %v3990_v49  ;;  %v3682_v49 = vor.u32 %v4521_v42, %v3681_v41  ;;  %v3394_v41 = vor.u32 %v4449_v28, %v3393_v26  ;;  %v4440_v42 = vld [vmem:[#allocation2 + $0x2dc] sm:$0xf]  ;;  %v3182_v47 = vor.u32 %v4392_v38, %v3179_v39  ;;  %v4041_v26 = vld [vmem:[#allocation2 + $0x818] sm:$0xf]  ;;  %v4611_v28 = vld [vmem:[#allocation2 + $0x82c] sm:$0xf0] }
  0x6d   :  { %1948 = vmatpush.bf16.msra.mxu0 %v3390_v56  ;;  %v3274_v56 = vor.u32 %v4419_v50, %v3273_v48  ;;  %v3921_v48 = vld [vmem:[#allocation2 + $0x728] sm:$0xf]  ;;  %v4557_v39 = vld [vmem:[#allocation2 + $0x67c] sm:$0xf0] }
  0x6e   :  { %1961 = vmatpush.bf16.msra.mxu1 %v3582_v60  ;;  %v3249_v60 = vld [vmem:[#allocation2 + $0x1e8] sm:$0xf] }
  0x6f   :  { %1974 = vmatpush.bf16.msra.mxu2 %v3774_v61  ;;  %v3658_v61 = vor.u32 %v4515_v54, %v3657_v53  ;;  %v3250_v6 = vor.u32 %v4413_v62, %v3249_v60  ;;  %v4113_v50 = vld [vmem:[#allocation2 + $0x8a8] sm:$0xf]  ;;  %v4386_v53 = vld [vmem:[#allocation2 + $0x12c] sm:$0xf]  ;;  %v3155_v54 = vld [vmem:[#allocation2 + $0x140] sm:$0xf0] }
  0x70   :  { %1987 = vmatpush.bf16.msra.mxu3 %v3966_v0  ;;  %1949 = vmatmul.bf16.vlgmr.msra.gmra.mxu0 %v4868_v20  ;;  %v4461_v0 = vld [vmem:[#allocation2 + $0x37c] sm:$0xf0]  ;;  %v3897_v60 = vld [vmem:[#allocation2 + $0x6f8] sm:$0xf]  ;;  %v3825_v38 = vld [vmem:[#allocation2 + $0x668] sm:$0xf] }
  0x71   :  { %1993 = vmatpush.bf16.msrb.mxu0 %v3178_v3  ;;  %1962 = vmatmul.bf16.vlgmr.msra.gmra.mxu1 %v4870_v21  ;;  %v3633_v3 = vld [vmem:[#allocation2 + $0x4e8] sm:$0xf]  ;;  %v3442_v7 = vor.u32 %v4461_v0, %v3441_v63  ;;  %v4089_v62 = vld [vmem:[#allocation2 + $0x878] sm:$0xf]  ;;  %v4623_v0 = vld [vmem:[#allocation2 + $0x88c] sm:$0xf0] }
  0x72   :  { %2006 = vmatpush.bf16.msrb.mxu1 %v3370_v4  ;;  %1975 = vmatmul.bf16.vlgmr.msra.gmra.mxu2 %v4877_v32  ;;  %v4509_v4 = vld [vmem:[#allocation2 + $0x4fc] sm:$0xf0] }
  0x73   :  { %2019 = vmatpush.bf16.msrb.mxu2 %v3562_v5  ;;  %1988 = vmatmul.bf16.vlgmr.msra.gmra.mxu3 %v4879_v36  ;;  %v3058_v5 = vor.u32 %v4365_v59, %v3057_v58  ;;  %v3634_v11 = vor.u32 %v4509_v4, %v3633_v3  ;;  %v4114_v58 = vor.u32 %v4629_v52, %v4113_v50  ;;  %v4380_v3 = vld [vmem:[#allocation2 + $0xfc] sm:$0xf]  ;;  %v3131_v4 = vld [vmem:[#allocation2 + $0x110] sm:$0xf0]  ;;  %v3801_v50 = vld [vmem:[#allocation2 + $0x638] sm:$0xf] }
  0x74   :  { %2032 = vmatpush.bf16.msrb.mxu3 %v3754_v9  ;;  %v4359_v9 = vld [vmem:[#allocation2 + $0x4c] sm:$0xf0]  ;;  %v3158_v59 = vor.u32 %v4386_v53, %v3155_v54  ;;  %v3993_v52 = vld [vmem:[#allocation2 + $0x7b8] sm:$0xf] }
  0x75   :  { %1994 = vmatpush.bf16.msrb.mxu0 %v3154_v15  ;;  %v3609_v15 = vld [vmem:[#allocation2 + $0x4b8] sm:$0xf]  ;;  %v4599_v54 = vld [vmem:[#allocation2 + $0x7cc] sm:$0xf0] }
  0x76   :  { %2007 = vmatpush.bf16.msrb.mxu1 %v3346_v16  ;;  %v4503_v16 = vld [vmem:[#allocation2 + $0x4cc] sm:$0xf0] }
  0x77   :  { %2020 = vmatpush.bf16.msrb.mxu2 %v3538_v17  ;;  %v3034_v17 = vor.u32 %v4359_v9, %v3033_v8  ;;  %v3610_v27 = vor.u32 %v4503_v16, %v3609_v15  ;;  %v4090_v8 = vor.u32 %v4623_v0, %v4089_v62  ;;  %v3134_v9 = vor.u32 %v4380_v3, %v3131_v4  ;;  %v4374_v15 = vld [vmem:[#allocation2 + $0xcc] sm:$0xf]  ;;  %v3107_v16 = vld [vmem:[#allocation2 + $0xe0] sm:$0xf0]  ;;  %v3969_v0 = vld [vmem:[#allocation2 + $0x788] sm:$0xf] }
  0x78   :  { %2033 = vmatpush.bf16.msrb.mxu3 %v3730_v23  ;;  %v3418_v23 = vor.u32 %v4455_v14, %v3417_v13  ;;  %v4617_v14 = vld [vmem:[#allocation2 + $0x85c] sm:$0xf0]  ;;  %v3994_v62 = vor.u32 %v4599_v54, %v3993_v52  ;;  %v4350_v4 = vld [vmem:[#allocation2 + $0xc] sm:$0xf] }
  0x79   :  { %1995 = vmatpush.bf16.msrb.mxu0 %v3130_v29  ;;  %v3585_v29 = vld [vmem:[#allocation2 + $0x488] sm:$0xf]  ;;  %v4593_v3 = vld [vmem:[#allocation2 + $0x79c] sm:$0xf0]  ;;  %v4518_v54 = vld [vmem:[#allocation2 + $0x54c] sm:$0xf] }
  0x7a   :  { %2008 = vmatpush.bf16.msrb.mxu1 %v3322_v30  ;;  %v4497_v30 = vld [vmem:[#allocation2 + $0x49c] sm:$0xf0] }
  0x7b   :  { %2021 = vmatpush.bf16.msrb.mxu2 %v3514_v31  ;;  %v3945_v31 = vld [vmem:[#allocation2 + $0x758] sm:$0xf] }
  0x7c   :  { %2034 = vmatpush.bf16.msrb.mxu3 %v3706_v37  ;;  %v4635_v37 = vld [vmem:[#allocation2 + $0x8ec] sm:$0xf0] }
  0x7d   :  { %1996 = vmatpush.bf16.msrb.mxu0 %v3106_v43  ;;  %v3371_v43 = vld [vmem:[#allocation2 + $0x2f0] sm:$0xf0]  ;;  %v4138_v46 = vor.u32 %v4635_v37, %v4137_v34  ;;  %v3850_v34 = vor.u32 %v4563_v25, %v3849_v24 }
  0x7e   :  { %2009 = vmatpush.bf16.msrb.mxu1 %v3298_v44  ;;  %v3586_v44 = vor.u32 %v4497_v30, %v3585_v29  ;;  %v3374_v51 = vor.u32 %v4440_v42, %v3371_v43  ;;  %v4368_v29 = vld [vmem:[#allocation2 + $0x9c] sm:$0xf]  ;;  %v3083_v30 = vld [vmem:[#allocation2 + $0xb0] sm:$0xf0]  ;;  %v4605_v42 = vld [vmem:[#allocation2 + $0x7fc] sm:$0xf0] }
  0x7f   :  { %2022 = vmatpush.bf16.msrb.mxu2 %v3490_v45  ;;  %v3946_v45 = vor.u32 %v4587_v33, %v3945_v31  ;;  %v4416_v31 = vld [vmem:[#allocation2 + $0x21c] sm:$0xf]  ;;  %v3275_v33 = vld [vmem:[#allocation2 + $0x230] sm:$0xf0]  ;;  %v3086_v37 = vor.u32 %v4368_v29, %v3083_v30  ;;  %v4362_v43 = vld [vmem:[#allocation2 + $0x6c] sm:$0xf] }
  0x80   :  { %2035 = vmatpush.bf16.msrb.mxu3 %v3682_v49  ;;  %v4581_v49 = vld [vmem:[#allocation2 + $0x73c] sm:$0xf0]  ;;  %v3731_v30 = vld [vmem:[#allocation2 + $0x5c0] sm:$0xf0] }
  0x81   :  { %1997 = vmatpush.bf16.msrb.mxu0 %v3082_v55  ;;  %v4434_v55 = vld [vmem:[#allocation2 + $0x2ac] sm:$0xf] }
  0x82   :  { %2010 = vmatpush.bf16.msrb.mxu1 %v3274_v56  ;;  %v3347_v56 = vld [vmem:[#allocation2 + $0x2c0] sm:$0xf0] }
  0x83   :  { %2023 = vmatpush.bf16.msrb.mxu2 %v3466_v57  ;;  %v3922_v57 = vor.u32 %v4581_v49, %v3921_v48  ;;  %v3350_v63 = vor.u32 %v4434_v55, %v3347_v56  ;;  %v4356_v55 = vld [vmem:[#allocation2 + $0x3c] sm:$0xf]  ;;  %v3035_v56 = vld [vmem:[#allocation2 + $0x50] sm:$0xf0] }
  0x84   :  { %2036 = vmatpush.bf16.msrb.mxu3 %v3658_v61  ;;  %v4575_v61 = vld [vmem:[#allocation2 + $0x70c] sm:$0xf0] }
  0x85   :  { %1998 = vmatpush.bf16.msrb.mxu0 %v3058_v5  ;;  %v4428_v5 = vld [vmem:[#allocation2 + $0x27c] sm:$0xf] }
  0x86   :  { %2011 = vmatpush.bf16.msrb.mxu1 %v3250_v6  ;;  %v3323_v6 = vld [vmem:[#allocation2 + $0x290] sm:$0xf0] }
  0x87   :  { %2024 = vmatpush.bf16.msrb.mxu2 %v3442_v7  ;;  %v3898_v7 = vor.u32 %v4575_v61, %v3897_v60  ;;  %v3326_v13 = vor.u32 %v4428_v5, %v3323_v6  ;;  %v3777_v60 = vld [vmem:[#allocation2 + $0x608] sm:$0xf]  ;;  %v4545_v61 = vld [vmem:[#allocation2 + $0x61c] sm:$0xf0]  ;;  %v3011_v6 = vld [vmem:[#allocation2 + $0x20] sm:$0xf0] }
  0x88   :  { %2037 = vmatpush.bf16.msrb.mxu3 %v3634_v11  ;;  %v4569_v11 = vld [vmem:[#allocation2 + $0x6dc] sm:$0xf0] }
  0x89   :  { %1999 = vmatpush.bf16.msrb.mxu0 %v3034_v17  ;;  %v4422_v17 = vld [vmem:[#allocation2 + $0x24c] sm:$0xf]  ;;  %v3874_v19 = vor.u32 %v4569_v11, %v3873_v10  ;;  %v3563_v10 = vld [vmem:[#allocation2 + $0x470] sm:$0xf0]  ;;  %v4536_v11 = vld [vmem:[#allocation2 + $0x5dc] sm:$0xf] }
  0x8a   :  { %2012 = vmatpush.bf16.msrb.mxu1 %v3226_v22  ;;  %v4066_v22 = vor.u32 %v4617_v14, %v4065_v12  ;;  %v3778_v12 = vor.u32 %v4545_v61, %v3777_v60  ;;  %v4584_v14 = vld [vmem:[#allocation2 + $0x75c] sm:$0xf]  ;;  %v4614_v60 = vld [vmem:[#allocation2 + $0x84c] sm:$0xf]  ;;  %v4067_v61 = vld [vmem:[#allocation2 + $0x860] sm:$0xf0] }
  0x8b   :  { %2025 = vmatpush.bf16.msrb.mxu2 %v3418_v23  ;;  %v3110_v23 = vor.u32 %v4374_v15, %v3107_v16  ;;  %v3947_v15 = vld [vmem:[#allocation2 + $0x770] sm:$0xf0]  ;;  %v3970_v16 = vor.u32 %v4593_v3, %v3969_v0 }
  0x8c   :  { %2038 = vmatpush.bf16.msrb.mxu3 %v3610_v27  ;;  %v3302_v27 = vor.u32 %v4422_v17, %v3299_v18  ;;  %v3014_v17 = vor.u32 %v4350_v4, %v3011_v6  ;;  %v4632_v18 = vld [vmem:[#allocation2 + $0x8dc] sm:$0xf]  ;;  %v3950_v25 = vor.u32 %v4584_v14, %v3947_v15 }
  0x8d   :  { %2000 = vmatpush.bf16.msrb.mxu0 %v3010_v35  ;;  %v4042_v35 = vor.u32 %v4611_v28, %v4041_v26  ;;  %v4482_v26 = vld [vmem:[#allocation2 + $0x42c] sm:$0xf]  ;;  %v4464_v4 = vld [vmem:[#allocation2 + $0x39c] sm:$0xf] }
  0x8e   :  { %2013 = vmatpush.bf16.msrb.mxu1 %v3202_v40  ;;  %v4017_v40 = vld [vmem:[#allocation2 + $0x7e8] sm:$0xf]  ;;  %v4530_v28 = vld [vmem:[#allocation2 + $0x5ac] sm:$0xf]  ;;  %v4512_v6 = vld [vmem:[#allocation2 + $0x51c] sm:$0xf] }
  0x8f   :  { %2026 = vmatpush.bf16.msrb.mxu2 %v3394_v41  ;;  %v3278_v41 = vor.u32 %v4416_v31, %v3275_v33  ;;  %v4018_v48 = vor.u32 %v4605_v42, %v4017_v40  ;;  %v4578_v31 = vld [vmem:[#allocation2 + $0x72c] sm:$0xf]  ;;  %v3923_v33 = vld [vmem:[#allocation2 + $0x740] sm:$0xf0]  ;;  %v4476_v40 = vld [vmem:[#allocation2 + $0x3fc] sm:$0xf] }
  0x90   :  { %2039 = vmatpush.bf16.msrb.mxu3 %v3586_v44  ;;  %2001 = vmatmul.bf16.vlgmr.msrb.gmra.mxu0 %v4859_v1  ;;  %v3059_v44 = vld [vmem:[#allocation2 + $0x80] sm:$0xf0]  ;;  %v4524_v42 = vld [vmem:[#allocation2 + $0x57c] sm:$0xf] }
  0x91   :  { %2045 = vmatpush.bf16.msra.mxu0 %v3946_v45  ;;  %2014 = vmatmul.bf16.vlgmr.msrb.gmra.mxu1 %v4861_v2  ;;  %v4410_v45 = vld [vmem:[#allocation2 + $0x1ec] sm:$0xf]  ;;  %v3062_v49 = vor.u32 %v4362_v43, %v3059_v44  ;;  %v3707_v44 = vld [vmem:[#allocation2 + $0x590] sm:$0xf0] }
  0x92   :  { %2058 = vmatpush.bf16.msra.mxu1 %v4138_v46  ;;  %2027 = vmatmul.bf16.vlgmr.msrb.gmra.mxu2 %v4868_v20  ;;  %v3251_v46 = vld [vmem:[#allocation2 + $0x200] sm:$0xf0] }
  0x93   :  { %2071 = vmatpush.bf16.msra.mxu2 %v3182_v47  ;;  %2040 = vmatmul.bf16.vlgmr.msrb.gmra.mxu3 %v4870_v21  ;;  %v3826_v47 = vor.u32 %v4557_v39, %v3825_v38  ;;  %v3254_v53 = vor.u32 %v4410_v45, %v3251_v46  ;;  %v3734_v38 = vor.u32 %v4530_v28, %v3731_v30  ;;  %v4572_v45 = vld [vmem:[#allocation2 + $0x6fc] sm:$0xf]  ;;  %v3899_v46 = vld [vmem:[#allocation2 + $0x710] sm:$0xf0]  ;;  %v4019_v30 = vld [vmem:[#allocation2 + $0x800] sm:$0xf0] }
  0x94   :  { %2084 = vmatpush.bf16.msra.mxu3 %v3374_v51  ;;  %v4551_v51 = vld [vmem:[#allocation2 + $0x64c] sm:$0xf0]  ;;  %v3926_v39 = vor.u32 %v4578_v31, %v3923_v33  ;;  %v3902_v52 = vor.u32 %v4572_v45, %v3899_v46  ;;  %v3995_v45 = vld [vmem:[#allocation2 + $0x7d0] sm:$0xf0] }
  0x95   :  { %2046 = vmatpush.bf16.msra.mxu0 %v3922_v57  ;;  %v4404_v57 = vld [vmem:[#allocation2 + $0x1bc] sm:$0xf] }
  0x96   :  { %2059 = vmatpush.bf16.msra.mxu1 %v4114_v58  ;;  %v3227_v58 = vld [vmem:[#allocation2 + $0x1d0] sm:$0xf0] }
  0x97   :  { %2072 = vmatpush.bf16.msra.mxu2 %v3158_v59  ;;  %v3802_v59 = vor.u32 %v4551_v51, %v3801_v50  ;;  %v3230_v5 = vor.u32 %v4404_v57, %v3227_v58  ;;  %v4470_v50 = vld [vmem:[#allocation2 + $0x3cc] sm:$0xf]  ;;  %v3710_v51 = vor.u32 %v4524_v42, %v3707_v44  ;;  %v3683_v57 = vld [vmem:[#allocation2 + $0x560] sm:$0xf0]  ;;  %v4548_v42 = vld [vmem:[#allocation2 + $0x63c] sm:$0xf] }
  0x98   :  { %2085 = vmatpush.bf16.msra.mxu3 %v3350_v63  ;;  %v3038_v63 = vor.u32 %v4356_v55, %v3035_v56  ;;  %v4900_v55 = vld [vmem:[%s5121_s2] sm:$0x3f]  ;;  %v4566_v58 = vld [vmem:[#allocation2 + $0x6cc] sm:$0xf]  ;;  %v3686_v0 = vor.u32 %v4518_v54, %v3683_v57  ;;  %v4596_v44 = vld [vmem:[#allocation2 + $0x7bc] sm:$0xf] }
  0x99   :  { %2047 = vmatpush.bf16.msra.mxu0 %v3898_v7  ;;  %v4398_v7 = vld [vmem:[#allocation2 + $0x18c] sm:$0xf]  ;;  %v3998_v57 = vor.u32 %v4596_v44, %v3995_v45 }
  0x9a   :  { %2060 = vmatpush.bf16.msra.mxu1 %v4090_v8  ;;  %v3203_v8 = vld [vmem:[#allocation2 + $0x1a0] sm:$0xf0]  ;;  %v4542_v54 = vld [vmem:[#allocation2 + $0x60c] sm:$0xf] }
  0x9b   :  { %2073 = vmatpush.bf16.msra.mxu2 %v3134_v9  ;;  %v4488_v9 = vld [vmem:[#allocation2 + $0x45c] sm:$0xf] }
  0x9c   :  { %2086 = vmatpush.bf16.msra.mxu3 %v3326_v13  ;;  %v3755_v13 = vld [vmem:[#allocation2 + $0x5f0] sm:$0xf0] }
  0x9d   :  { %2048 = vmatpush.bf16.msra.mxu0 %v3874_v19  ;;  %v4139_v19 = vld [vmem:[#allocation2 + $0x8f0] sm:$0xf0]  ;;  %v3758_v24 = vor.u32 %v4536_v11, %v3755_v13 }
  0x9e   :  { %2061 = vmatpush.bf16.msra.mxu1 %v4066_v22  ;;  %v3206_v22 = vor.u32 %v4398_v7, %v3203_v8  ;;  %v4142_v29 = vor.u32 %v4632_v18, %v4139_v19  ;;  %v4070_v8 = vor.u32 %v4614_v60, %v4067_v61  ;;  %v3851_v11 = vld [vmem:[#allocation2 + $0x6b0] sm:$0xf0]  ;;  %v4458_v19 = vld [vmem:[#allocation2 + $0x36c] sm:$0xf]  ;;  %v3971_v60 = vld [vmem:[#allocation2 + $0x7a0] sm:$0xf0] }
  0x9f   :  { %2074 = vmatpush.bf16.msra.mxu2 %v3110_v23  ;;  %v3566_v23 = vor.u32 %v4488_v9, %v3563_v10  ;;  %v3659_v9 = vld [vmem:[#allocation2 + $0x530] sm:$0xf0]  ;;  %v4560_v10 = vld [vmem:[#allocation2 + $0x69c] sm:$0xf] }
  0xa0   :  { %2087 = vmatpush.bf16.msra.mxu3 %v3302_v27  ;;  %v3539_v27 = vld [vmem:[#allocation2 + $0x440] sm:$0xf0]  ;;  %v4043_v13 = vld [vmem:[#allocation2 + $0x830] sm:$0xf0]  ;;  %v3854_v18 = vor.u32 %v4560_v10, %v3851_v11  ;;  %v3761_v11 = vld [vmem:[#allocation2 + $0x5e0] sm:$0xf] }
  0xa1   :  { %2049 = vmatpush.bf16.msra.mxu0 %v3850_v34  ;;  %v4626_v34 = vld [vmem:[#allocation2 + $0x8ac] sm:$0xf] }
  0xa2   :  { %2062 = vmatpush.bf16.msra.mxu1 %v4042_v35  ;;  %v4115_v35 = vld [vmem:[#allocation2 + $0x8c0] sm:$0xf0] }
  0xa3   :  { %2075 = vmatpush.bf16.msra.mxu2 %v3086_v37  ;;  %v3542_v37 = vor.u32 %v4482_v26, %v3539_v27  ;;  %v4118_v43 = vor.u32 %v4626_v34, %v4115_v35  ;;  %v4554_v26 = vld [vmem:[#allocation2 + $0x66c] sm:$0xf]  ;;  %v3827_v27 = vld [vmem:[#allocation2 + $0x680] sm:$0xf0]  ;;  %v4452_v35 = vld [vmem:[#allocation2 + $0x33c] sm:$0xf] }
  0xa4   :  { %2088 = vmatpush.bf16.msra.mxu3 %v3278_v41  ;;  %v3515_v41 = vld [vmem:[#allocation2 + $0x410] sm:$0xf0]  ;;  %v3830_v34 = vor.u32 %v4554_v26, %v3827_v27  ;;  %v3737_v26 = vld [vmem:[#allocation2 + $0x5b0] sm:$0xf]  ;;  %v4534_v27 = vld [vmem:[#allocation2 + $0x5c4] sm:$0xf0] }
  0xa5   :  { %2050 = vmatpush.bf16.msra.mxu0 %v3826_v47  ;;  %v4620_v47 = vld [vmem:[#allocation2 + $0x87c] sm:$0xf] }
  0xa6   :  { %2063 = vmatpush.bf16.msra.mxu1 %v4018_v48  ;;  %v4091_v48 = vld [vmem:[#allocation2 + $0x890] sm:$0xf0] }
  0xa7   :  { %2076 = vmatpush.bf16.msra.mxu2 %v3062_v49  ;;  %v3518_v49 = vor.u32 %v4476_v40, %v3515_v41  ;;  %v4094_v56 = vor.u32 %v4620_v47, %v4091_v48  ;;  %v3611_v41 = vld [vmem:[#allocation2 + $0x4d0] sm:$0xf0]  ;;  %v4446_v48 = vld [vmem:[#allocation2 + $0x30c] sm:$0xf] }
  0xa8   :  { %2089 = vmatpush.bf16.msra.mxu3 %v3254_v53  ;;  %v3491_v53 = vld [vmem:[#allocation2 + $0x3e0] sm:$0xf0] }
  0xa9   :  { %2051 = vmatpush.bf16.msra.mxu0 %v3802_v59  ;;  %v3875_v59 = vld [vmem:[#allocation2 + $0x6e0] sm:$0xf0] }
  0xaa   :  { %2064 = vmatpush.bf16.msra.mxu1 %v3994_v62  ;;  %v3494_v62 = vor.u32 %v4470_v50, %v3491_v53  ;;  %v3878_v3 = vor.u32 %v4566_v58, %v3875_v59  ;;  %v3587_v53 = vld [vmem:[#allocation2 + $0x4a0] sm:$0xf0]  ;;  %v4590_v59 = vld [vmem:[#allocation2 + $0x78c] sm:$0xf] }
  0xab   :  { %2077 = vmatpush.bf16.msra.mxu2 %v3038_v63  ;;  %v364_v63 = vperm.slane %v4900_v55, 0  ;;  %v3779_v58 = vld [vmem:[#allocation2 + $0x620] sm:$0xf0] }
  0xac   :  { %2090 = vmatpush.bf16.msra.mxu3 %v3230_v5  ;;  %v3467_v5 = vld [vmem:[#allocation2 + $0x3b0] sm:$0xf0]  ;;  %v3782_v10 = vor.u32 %v4542_v54, %v3779_v58 }
  0xad   :  { %2052 = vmatpush.bf16.msra.mxu0 %v3778_v12  ;;  %v4608_v12 = vld [vmem:[#allocation2 + $0x81c] sm:$0xf]  ;;  %v1846_v14 = vpop.f32.mrf.mxu0  ;;  %v3470_v15 = vor.u32 %v4464_v4, %v3467_v5  ;;  %v4444_v5 = vld [vmem:[#allocation2 + $0x2f4] sm:$0xf0] }
  0xae   :  { %2065 = vmatpush.bf16.msra.mxu1 %v3970_v16  ;;  %v1859_v7 = vpop.f32.mrf.mxu1  ;;  %v1847_v16 = vadd.f32 %v1846_v14, %v364_v63  ;;  %v3185_v63 = vld [vmem:[#allocation2 + $0x160] sm:$0xf] }
  0xaf   :  { %2078 = vmatpush.bf16.msra.mxu2 %v3014_v17  ;;  %v3662_v17 = vor.u32 %v4512_v6, %v3659_v9  ;;  %v3569_v6 = vld [vmem:[#allocation2 + $0x460] sm:$0xf] }
  0xb0   :  { %2091 = vmatpush.bf16.msra.mxu3 %v3206_v22  ;;  %2053 = vmatmul.bf16.vlgmr.msra.gmra.mxu0 %v4877_v32  ;;  %v3443_v22 = vld [vmem:[#allocation2 + $0x380] sm:$0xf0]  ;;  %v1860_v28 = vadd.f32 %v1859_v7, %v1847_v16  ;;  %v4492_v7 = vld [vmem:[#allocation2 + $0x474] sm:$0xf0] }
  0xb1   :  { %2097 = vmatpush.bf16.msrb.mxu0 %v3566_v23  ;;  %2066 = vmatmul.bf16.vlgmr.msra.gmra.mxu1 %v4879_v36  ;;  %v4506_v23 = vld [vmem:[#allocation2 + $0x4ec] sm:$0xf]  ;;  %v3446_v31 = vor.u32 %v4458_v19, %v3443_v22  ;;  %v3570_v16 = vor.u32 %v4492_v7, %v3569_v6  ;;  %v3353_v19 = vld [vmem:[#allocation2 + $0x2b0] sm:$0xf]  ;;  %v4420_v6 = vld [vmem:[#allocation2 + $0x234] sm:$0xf0] }
  0xb2   :  { %2110 = vmatpush.bf16.msrb.mxu1 %v3758_v24  ;;  %2079 = vmatmul.bf16.vlgmr.msra.gmra.mxu2 %v4859_v1  ;;  %v4046_v24 = vor.u32 %v4608_v12, %v4043_v13  ;;  %v4540_v12 = vld [vmem:[#allocation2 + $0x5f4] sm:$0xf0]  ;;  %v3974_v13 = vor.u32 %v4590_v59, %v3971_v60  ;;  %v3473_v7 = vld [vmem:[#allocation2 + $0x3a0] sm:$0xf] }
  0xb3   :  { %2123 = vmatpush.bf16.msrb.mxu2 %v3950_v25  ;;  %2092 = vmatmul.bf16.vlgmr.msra.gmra.mxu3 %v4861_v2  ;;  %v3635_v25 = vld [vmem:[#allocation2 + $0x500] sm:$0xf0]  ;;  %v3762_v22 = vor.u32 %v4540_v12, %v3761_v11  ;;  %v4516_v11 = vld [vmem:[#allocation2 + $0x534] sm:$0xf0] }
  0xb4   :  { %2136 = vmatpush.bf16.msrb.mxu3 %v4142_v29  ;;  %v4602_v29 = vld [vmem:[#allocation2 + $0x7ec] sm:$0xf]  ;;  %v3638_v33 = vor.u32 %v4506_v23, %v3635_v25  ;;  %v4438_v23 = vld [vmem:[#allocation2 + $0x2c4] sm:$0xf0] }
  0xb5   :  { %2098 = vmatpush.bf16.msrb.mxu0 %v3542_v37  ;;  %v3419_v37 = vld [vmem:[#allocation2 + $0x350] sm:$0xf0]  ;;  %v4022_v40 = vor.u32 %v4602_v29, %v4019_v30  ;;  %v1848_v46 = vpop.f32.mrf.mxu0  ;;  %v4486_v25 = vld [vmem:[#allocation2 + $0x444] sm:$0xf0] }
  0xb6   :  { %2111 = vmatpush.bf16.msrb.mxu1 %v3734_v38  ;;  %v4500_v38 = vld [vmem:[#allocation2 + $0x4bc] sm:$0xf]  ;;  %v3422_v47 = vor.u32 %v4452_v35, %v3419_v37  ;;  %v4384_v35 = vld [vmem:[#allocation2 + $0x114] sm:$0xf0]  ;;  %v3329_v37 = vld [vmem:[#allocation2 + $0x280] sm:$0xf] }
  0xb7   :  { %2124 = vmatpush.bf16.msrb.mxu2 %v3926_v39  ;;  %v1861_v39 = vpop.f32.mrf.mxu1  ;;  %v3614_v50 = vor.u32 %v4500_v38, %v3611_v41  ;;  %v3738_v38 = vor.u32 %v4534_v27, %v3737_v26  ;;  %v4480_v41 = vld [vmem:[#allocation2 + $0x414] sm:$0xf0]  ;;  %v4510_v26 = vld [vmem:[#allocation2 + $0x504] sm:$0xf0] }
  0xb8   :  { %2137 = vmatpush.bf16.msrb.mxu3 %v4118_v43  ;;  %v3803_v43 = vld [vmem:[#allocation2 + $0x650] sm:$0xf0]  ;;  %v4432_v39 = vld [vmem:[#allocation2 + $0x294] sm:$0xf0] }
  0xb9   :  { %2099 = vmatpush.bf16.msrb.mxu0 %v3518_v49  ;;  %v3395_v49 = vld [vmem:[#allocation2 + $0x320] sm:$0xf0]  ;;  %v3330_v45 = vor.u32 %v4432_v39, %v3329_v37  ;;  %v4360_v37 = vld [vmem:[#allocation2 + $0x54] sm:$0xf0] }
  0xba   :  { %2112 = vmatpush.bf16.msrb.mxu1 %v3710_v51  ;;  %v3806_v51 = vor.u32 %v4548_v42, %v3803_v43  ;;  %v3398_v4 = vor.u32 %v4446_v48, %v3395_v49  ;;  %v3713_v42 = vld [vmem:[#allocation2 + $0x580] sm:$0xf]  ;;  %v4528_v43 = vld [vmem:[#allocation2 + $0x594] sm:$0xf0]  ;;  %v4378_v48 = vld [vmem:[#allocation2 + $0xe4] sm:$0xf0] }
  0xbb   :  { %2125 = vmatpush.bf16.msrb.mxu2 %v3902_v52  ;;  %v4494_v52 = vld [vmem:[#allocation2 + $0x48c] sm:$0xf]  ;;  %v3305_v49 = vld [vmem:[#allocation2 + $0x250] sm:$0xf] }
  0xbc   :  { %2138 = vmatpush.bf16.msrb.mxu3 %v4094_v56  ;;  %v1872_v56 = vpop.f32.mrf.mxu2  ;;  %v3590_v9 = vor.u32 %v4494_v52, %v3587_v53  ;;  %v3497_v52 = vld [vmem:[#allocation2 + $0x3d0] sm:$0xf]  ;;  %v4474_v53 = vld [vmem:[#allocation2 + $0x3e4] sm:$0xf0] }
  0xbd   :  { %2100 = vmatpush.bf16.msrb.mxu0 %v3494_v62  ;;  %v1873_v61 = vadd.f32 %v1872_v56, %v1860_v28  ;;  %v1885_v62 = vpop.f32.mrf.mxu3  ;;  %v3689_v56 = vld [vmem:[#allocation2 + $0x550] sm:$0xf] }
  0xbe   :  { %2113 = vmatpush.bf16.msrb.mxu1 %v3686_v0  ;;  %v4396_v0 = vld [vmem:[#allocation2 + $0x174] sm:$0xf0] }
  0xbf   :  { %2126 = vmatpush.bf16.msrb.mxu2 %v3878_v3  ;;  %v3377_v3 = vld [vmem:[#allocation2 + $0x2e0] sm:$0xf]  ;;  %v3186_v14 = vor.u32 %v4396_v0, %v3185_v63  ;;  %v4372_v0 = vld [vmem:[#allocation2 + $0xb4] sm:$0xf0] }
  0xc0   :  { %2139 = vmatpush.bf16.msrb.mxu3 %v4070_v8  ;;  %v4903_v8 = vadd.f32 %v1885_v62, %v1873_v61  ;;  %v3498_v62 = vor.u32 %v4474_v53, %v3497_v52  ;;  %v3089_v63 = vld [vmem:[#allocation2 + $0xa0] sm:$0xf]  ;;  %v4402_v52 = vld [vmem:[#allocation2 + $0x1a4] sm:$0xf0]  ;;  %v3401_v53 = vld [vmem:[#allocation2 + $0x310] sm:$0xf] }
  0xc1   :  { %2101 = vmatpush.bf16.msrb.mxu0 %v3470_v15  ;;  %v3378_v15 = vor.u32 %v4444_v5, %v3377_v3  ;;  %v3281_v3 = vld [vmem:[#allocation2 + $0x220] sm:$0xf]  ;;  %v3090_v12 = vor.u32 %v4372_v0, %v3089_v63 }
  0xc2   :  { %2114 = vmatpush.bf16.msrb.mxu1 %v3662_v17  ;;  %v3161_v17 = vld [vmem:[#allocation2 + $0x130] sm:$0xf] }
  0xc3   :  { %2127 = vmatpush.bf16.msrb.mxu2 %v3854_v18  ;;  %v4390_v18 = vld [vmem:[#allocation2 + $0x144] sm:$0xf0] }
  0xc4   :  { %2140 = vmatpush.bf16.msrb.mxu3 %v4046_v24  ;;  %v3545_v24 = vld [vmem:[#allocation2 + $0x430] sm:$0xf]  ;;  %v1874_v28 = vpop.f32.mrf.mxu2  ;;  %v3162_v29 = vor.u32 %v4390_v18, %v3161_v17 }
  0xc5   :  { %2102 = vmatpush.bf16.msrb.mxu0 %v3446_v31  ;;  %v1887_v30 = vpop.f32.mrf.mxu3  ;;  %v3354_v31 = vor.u32 %v4438_v23, %v3353_v19  ;;  %v3257_v17 = vld [vmem:[#allocation2 + $0x1f0] sm:$0xf]  ;;  %v4414_v19 = vld [vmem:[#allocation2 + $0x204] sm:$0xf0] }
  0xc6   :  { %2115 = vmatpush.bf16.msrb.mxu1 %v3638_v33  ;;  %v3546_v33 = vor.u32 %v4486_v25, %v3545_v24  ;;  %v4462_v23 = vld [vmem:[#allocation2 + $0x384] sm:$0xf0]  ;;  %v3641_v25 = vld [vmem:[#allocation2 + $0x4f0] sm:$0xf] }
  0xc7   :  { %2128 = vmatpush.bf16.msrb.mxu2 %v3830_v34  ;;  %v3137_v34 = vld [vmem:[#allocation2 + $0x100] sm:$0xf] }
  0xc8   :  { %2141 = vmatpush.bf16.msrb.mxu3 %v4022_v40  ;;  %v3521_v40 = vld [vmem:[#allocation2 + $0x400] sm:$0xf]  ;;  %v3138_v44 = vor.u32 %v4384_v35, %v3137_v34 }
  0xc9   :  { %2103 = vmatpush.bf16.msrb.mxu0 %v3422_v47  ;;  %v3522_v46 = vor.u32 %v4480_v41, %v3521_v40  ;;  %v3113_v47 = vld [vmem:[#allocation2 + $0xd0] sm:$0xf]  ;;  %v3041_v35 = vld [vmem:[#allocation2 + $0x40] sm:$0xf]  ;;  %v3642_v40 = vor.u32 %v4510_v26, %v3641_v25  ;;  %v4408_v41 = vld [vmem:[#allocation2 + $0x1d4] sm:$0xf0] }
  0xca   :  { %2116 = vmatpush.bf16.msrb.mxu1 %v3614_v50  ;;  %v3714_v50 = vor.u32 %v4528_v43, %v3713_v42  ;;  %v3114_v59 = vor.u32 %v4378_v48, %v3113_v47  ;;  %v3425_v42 = vld [vmem:[#allocation2 + $0x340] sm:$0xf]  ;;  %v4456_v43 = vld [vmem:[#allocation2 + $0x354] sm:$0xf0]  ;;  %v3017_v47 = vld [vmem:[#allocation2 + $0x10] sm:$0xf] }
  0xcb   :  { %2129 = vmatpush.bf16.msrb.mxu2 %v3806_v51  ;;  %v4426_v51 = vld [vmem:[#allocation2 + $0x264] sm:$0xf0]  ;;  %v3355_v25 = vld [vmem:[#allocation2 + $0x2c8] sm:$0xf0] }
  0xcc   :  { %2142 = vmatpush.bf16.msrb.mxu3 %v3998_v57  ;;  %v4522_v57 = vld [vmem:[#allocation2 + $0x564] sm:$0xf0]  ;;  %v3306_v61 = vor.u32 %v4426_v51, %v3305_v49  ;;  %v3209_v51 = vld [vmem:[#allocation2 + $0x190] sm:$0xf] }
  0xcd   :  { %2104 = vmatpush.bf16.msrb.mxu0 %v3398_v4  ;;  %v1898_v54 = vpop.f32.mrf.mxu0  ;;  %v3690_v4 = vor.u32 %v4522_v57, %v3689_v56  ;;  %v4354_v48 = vld [vmem:[#allocation2 + $0x24] sm:$0xf0]  ;;  %v3593_v57 = vld [vmem:[#allocation2 + $0x490] sm:$0xf] }
  0xce   :  { %2117 = vmatpush.bf16.msrb.mxu1 %v3590_v9  ;;  %v1899_v58 = vadd.f32 %v1898_v54, %v4903_v8  ;;  %v1911_v60 = vpop.f32.mrf.mxu1  ;;  %v4468_v9 = vld [vmem:[#allocation2 + $0x3b4] sm:$0xf0]  ;;  %v365_v8 = vperm.slane %v4900_v55, 1  ;;  %v4450_v56 = vld [vmem:[#allocation2 + $0x324] sm:$0xf0]  ;;  %v3018_v0 = vor.u32 %v4354_v48, %v3017_v47 }
  0xcf   :  { %2130 = vmatpush.bf16.msrb.mxu2 %v3782_v10  ;;  %v3665_v10 = vld [vmem:[#allocation2 + $0x520] sm:$0xf]  ;;  %v4618_v48 = vld [vmem:[#allocation2 + $0x864] sm:$0xf0] }
  0xd0   :  { %2143 = vmatpush.bf16.msrb.mxu3 %v3974_v13  ;;  %2105 = vmatmul.bf16.vlgmr.msrb.gmra.mxu0 %v4868_v20  ;;  %v4910_v5 = vadd.f32 %v1911_v60, %v1899_v58  ;;  %v3282_v13 = vor.u32 %v4420_v6, %v3281_v3  ;;  %v3666_v18 = vor.u32 %v4516_v11, %v3665_v10  ;;  %v4498_v58 = vld [vmem:[#allocation2 + $0x4a4] sm:$0xf0]  ;;  %v3953_v60 = vld [vmem:[#allocation2 + $0x760] sm:$0xf]  ;;  %v4636_v3 = vld [vmem:[#allocation2 + $0x8f4] sm:$0xf0] }
  0xd1   :  { %2149 = vmatpush.bf16.msra.mxu0 %v3186_v14  ;;  %2118 = vmatmul.bf16.vlgmr.msrb.gmra.mxu1 %v4870_v21  ;;  %v3474_v14 = vor.u32 %v4468_v9, %v3473_v7  ;;  %v3187_v6 = vld [vmem:[#allocation2 + $0x178] sm:$0xf0]  ;;  %v3210_v7 = vor.u32 %v4402_v52, %v3209_v51  ;;  %v3402_v9 = vor.u32 %v4450_v56, %v3401_v53  ;;  %v4441_v10 = vld [vmem:[#allocation2 + $0x2e4] sm:$0xf]  ;;  %v4423_v51 = vld [vmem:[#allocation2 + $0x254] sm:$0xf] }
  0xd2   :  { %2162 = vmatpush.bf16.msra.mxu1 %v3378_v15  ;;  %2131 = vmatmul.bf16.vlgmr.msrb.gmra.mxu2 %v4877_v32  ;;  %v3065_v15 = vld [vmem:[#allocation2 + $0x70] sm:$0xf]  ;;  %v3379_v11 = vld [vmem:[#allocation2 + $0x2f8] sm:$0xf0]  ;;  %v3307_v52 = vld [vmem:[#allocation2 + $0x268] sm:$0xf0] }
  0xd3   :  { %2175 = vmatpush.bf16.msra.mxu2 %v3570_v16  ;;  %2144 = vmatmul.bf16.vlgmr.msrb.gmra.mxu3 %v4879_v36  ;;  %v4366_v16 = vld [vmem:[#allocation2 + $0x84] sm:$0xf0] }
  0xd4   :  { %2188 = vmatpush.bf16.msra.mxu3 %v3762_v22  ;;  %v3449_v22 = vld [vmem:[#allocation2 + $0x370] sm:$0xf]  ;;  %v3066_v30 = vor.u32 %v4366_v16, %v3065_v15  ;;  %v4582_v16 = vld [vmem:[#allocation2 + $0x744] sm:$0xf0] }
  0xd5   :  { %2150 = vmatpush.bf16.msra.mxu0 %v3162_v29  ;;  %v1924_v24 = vpop.f32.mrf.mxu2  ;;  %v1900_v29 = vpop.f32.mrf.mxu0  ;;  %v3450_v34 = vor.u32 %v4462_v23, %v3449_v22  ;;  %v3929_v15 = vld [vmem:[#allocation2 + $0x730] sm:$0xf]  ;;  %v4387_v22 = vld [vmem:[#allocation2 + $0x134] sm:$0xf]  ;;  %v3163_v23 = vld [vmem:[#allocation2 + $0x148] sm:$0xf0] }
  0xd6   :  { %2163 = vmatpush.bf16.msra.mxu1 %v3354_v31  ;;  %v1925_v27 = vadd.f32 %v1924_v24, %v365_v8  ;;  %v1937_v28 = vpop.f32.mrf.mxu3  ;;  %v1913_v31 = vpop.f32.mrf.mxu1  ;;  %v3594_v8 = vor.u32 %v4498_v58, %v3593_v57  ;;  %v4435_v24 = vld [vmem:[#allocation2 + $0x2b4] sm:$0xf]  ;;  %v3930_v26 = vor.u32 %v4582_v16, %v3929_v15  ;;  %v3905_v29 = vld [vmem:[#allocation2 + $0x700] sm:$0xf] }
  0xd7   :  { %2176 = vmatpush.bf16.msra.mxu2 %v3546_v33  ;;  %v3258_v33 = vor.u32 %v4414_v19, %v3257_v17  ;;  %v4121_v17 = vld [vmem:[#allocation2 + $0x8b0] sm:$0xf]  ;;  %v4630_v19 = vld [vmem:[#allocation2 + $0x8c4] sm:$0xf0]  ;;  %v4097_v31 = vld [vmem:[#allocation2 + $0x880] sm:$0xf] }
  0xd8   :  { %2189 = vmatpush.bf16.msra.mxu3 %v3738_v38  ;;  %v3233_v38 = vld [vmem:[#allocation2 + $0x1c0] sm:$0xf]  ;;  %v4913_v39 = vadd.f32 %v1937_v28, %v1925_v27  ;;  %v4122_v27 = vor.u32 %v4630_v19, %v4121_v17  ;;  %v3166_v28 = vor.u32 %v4387_v22, %v3163_v23  ;;  %v4363_v19 = vld [vmem:[#allocation2 + $0x74] sm:$0xf]  ;;  %v3067_v22 = vld [vmem:[#allocation2 + $0x88] sm:$0xf0] }
  0xd9   :  { %2151 = vmatpush.bf16.msra.mxu0 %v3138_v44  ;;  %v3617_v44 = vld [vmem:[#allocation2 + $0x4c0] sm:$0xf]  ;;  %v3234_v49 = vor.u32 %v4408_v41, %v3233_v38  ;;  %v4429_v38 = vld [vmem:[#allocation2 + $0x284] sm:$0xf]  ;;  %v4411_v23 = vld [vmem:[#allocation2 + $0x1f4] sm:$0xf] }
  0xda   :  { %2164 = vmatpush.bf16.msra.mxu1 %v3330_v45  ;;  %v4504_v45 = vld [vmem:[#allocation2 + $0x4d4] sm:$0xf0] }
  0xdb   :  { %2177 = vmatpush.bf16.msra.mxu2 %v3522_v46  ;;  %v3042_v46 = vor.u32 %v4360_v37, %v3041_v35  ;;  %v3618_v54 = vor.u32 %v4504_v45, %v3617_v44  ;;  %v4381_v35 = vld [vmem:[#allocation2 + $0x104] sm:$0xf]  ;;  %v3139_v37 = vld [vmem:[#allocation2 + $0x118] sm:$0xf0]  ;;  %v3881_v44 = vld [vmem:[#allocation2 + $0x6d0] sm:$0xf] }
  0xdc   :  { %2190 = vmatpush.bf16.msra.mxu3 %v3714_v50  ;;  %v3426_v50 = vor.u32 %v4456_v43, %v3425_v42  ;;  %v3142_v43 = vor.u32 %v4381_v35, %v3139_v37  ;;  %v4570_v45 = vld [vmem:[#allocation2 + $0x6e4] sm:$0xf0]  ;;  %v4600_v37 = vld [vmem:[#allocation2 + $0x7d4] sm:$0xf0] }
  0xdd   :  { %2152 = vmatpush.bf16.msra.mxu0 %v3114_v59  ;;  %v1926_v59 = vpop.f32.mrf.mxu2  ;;  %v3882_v53 = vor.u32 %v4570_v45, %v3881_v44  ;;  %v3785_v44 = vld [vmem:[#allocation2 + $0x610] sm:$0xf]  ;;  %v4546_v45 = vld [vmem:[#allocation2 + $0x624] sm:$0xf0] }
  0xde   :  { %2165 = vmatpush.bf16.msra.mxu1 %v3306_v61  ;;  %v4588_v61 = vld [vmem:[#allocation2 + $0x774] sm:$0xf0]  ;;  %v1939_v63 = vpop.f32.mrf.mxu3 }
  0xdf   :  { %2178 = vmatpush.bf16.msra.mxu2 %v3498_v62  ;;  %v4145_v62 = vld [vmem:[#allocation2 + $0x8e0] sm:$0xf]  ;;  %v3310_v63 = vor.u32 %v4423_v51, %v3307_v52 }
  0xe0   :  { %2191 = vmatpush.bf16.msra.mxu3 %v3690_v4  ;;  %v4393_v4 = vld [vmem:[#allocation2 + $0x164] sm:$0xf] }
  0xe1   :  { %2153 = vmatpush.bf16.msra.mxu0 %v3090_v12  ;;  %v3954_v12 = vor.u32 %v4588_v61, %v3953_v60  ;;  %v3857_v60 = vld [vmem:[#allocation2 + $0x6a0] sm:$0xf]  ;;  %v4564_v61 = vld [vmem:[#allocation2 + $0x6b4] sm:$0xf0] }
  0xe2   :  { %2166 = vmatpush.bf16.msra.mxu1 %v3282_v13  ;;  %v4146_v13 = vor.u32 %v4636_v3, %v4145_v62  ;;  %v4049_v62 = vld [vmem:[#allocation2 + $0x820] sm:$0xf]  ;;  %v4369_v3 = vld [vmem:[#allocation2 + $0xa4] sm:$0xf] }
  0xe3   :  { %2179 = vmatpush.bf16.msra.mxu2 %v3474_v14  ;;  %v3190_v14 = vor.u32 %v4393_v4, %v3187_v6  ;;  %v3091_v4 = vld [vmem:[#allocation2 + $0xb8] sm:$0xf0] }
  0xe4   :  { %2192 = vmatpush.bf16.msra.mxu3 %v3666_v18  ;;  %v3382_v18 = vor.u32 %v4441_v10, %v3379_v11  ;;  %v3858_v10 = vor.u32 %v4564_v61, %v3857_v60  ;;  %v4537_v60 = vld [vmem:[#allocation2 + $0x5e4] sm:$0xf]  ;;  %v3786_v61 = vor.u32 %v4546_v45, %v3785_v44  ;;  %v4519_v44 = vld [vmem:[#allocation2 + $0x554] sm:$0xf] }
  0xe5   :  { %2154 = vmatpush.bf16.msra.mxu0 %v3066_v30  ;;  %v4576_v30 = vld [vmem:[#allocation2 + $0x714] sm:$0xf0] }
  0xe6   :  { %2167 = vmatpush.bf16.msra.mxu1 %v3258_v33  ;;  %v3358_v33 = vor.u32 %v4435_v24, %v3355_v25  ;;  %v3906_v41 = vor.u32 %v4576_v30, %v3905_v29  ;;  %v3259_v24 = vld [vmem:[#allocation2 + $0x208] sm:$0xf0]  ;;  %v3070_v29 = vor.u32 %v4363_v19, %v3067_v22  ;;  %v3809_v30 = vld [vmem:[#allocation2 + $0x640] sm:$0xf] }
  0xe7   :  { %2180 = vmatpush.bf16.msra.mxu2 %v3450_v34  ;;  %v4624_v34 = vld [vmem:[#allocation2 + $0x894] sm:$0xf0]  ;;  %v3262_v35 = vor.u32 %v4411_v23, %v3259_v24  ;;  %v4123_v19 = vld [vmem:[#allocation2 + $0x8c8] sm:$0xf0] }
  0xe8   :  { %2193 = vmatpush.bf16.msra.mxu3 %v3642_v40  ;;  %v3331_v40 = vld [vmem:[#allocation2 + $0x298] sm:$0xf0]  ;;  %v4098_v42 = vor.u32 %v4624_v34, %v4097_v31  ;;  %v4552_v31 = vld [vmem:[#allocation2 + $0x654] sm:$0xf0] }
  0xe9   :  { %2155 = vmatpush.bf16.msra.mxu0 %v3042_v46  ;;  %v4073_v46 = vld [vmem:[#allocation2 + $0x850] sm:$0xf]  ;;  %v3334_v47 = vor.u32 %v4429_v38, %v3331_v40  ;;  %v4357_v38 = vld [vmem:[#allocation2 + $0x44] sm:$0xf]  ;;  %v3043_v40 = vld [vmem:[#allocation2 + $0x58] sm:$0xf0] }
  0xea   :  { %2168 = vmatpush.bf16.msra.mxu1 %v3234_v49  ;;  %v4375_v49 = vld [vmem:[#allocation2 + $0xd4] sm:$0xf]  ;;  %v4074_v56 = vor.u32 %v4618_v48, %v4073_v46  ;;  %v3977_v48 = vld [vmem:[#allocation2 + $0x790] sm:$0xf] }
  0xeb   :  { %2181 = vmatpush.bf16.msra.mxu2 %v3426_v50  ;;  %v3115_v50 = vld [vmem:[#allocation2 + $0xe8] sm:$0xf0] }
  0xec   :  { %2194 = vmatpush.bf16.msra.mxu3 %v3618_v54  ;;  %v3118_v57 = vor.u32 %v4375_v49, %v3115_v50  ;;  %v4594_v49 = vld [vmem:[#allocation2 + $0x7a4] sm:$0xf0]  ;;  %v4351_v50 = vld [vmem:[#allocation2 + $0x14] sm:$0xf] }
  0xed   :  { %2156 = vmatpush.bf16.msra.mxu0 %v3018_v0  ;;  %v1950_v54 = vpop.f32.mrf.mxu0  ;;  %v4612_v0 = vld [vmem:[#allocation2 + $0x834] sm:$0xf0] }
  0xee   :  { %2169 = vmatpush.bf16.msra.mxu1 %v3210_v7  ;;  %v1951_v58 = vadd.f32 %v1950_v54, %v4913_v39  ;;  %v1963_v59 = vpop.f32.mrf.mxu1  ;;  %v4417_v7 = vld [vmem:[#allocation2 + $0x224] sm:$0xf]  ;;  %v4050_v11 = vor.u32 %v4612_v0, %v4049_v62  ;;  %v3833_v39 = vld [vmem:[#allocation2 + $0x670] sm:$0xf]  ;;  %v4399_v54 = vld [vmem:[#allocation2 + $0x194] sm:$0xf] }
  0xef   :  { %2182 = vmatpush.bf16.msra.mxu2 %v3402_v9  ;;  %v3283_v9 = vld [vmem:[#allocation2 + $0x238] sm:$0xf0] }
  0xf0   :  { %2195 = vmatpush.bf16.msra.mxu3 %v3594_v8  ;;  %2157 = vmatmul.bf16.vlgmr.msra.gmra.mxu0 %v4859_v1  ;;  %v1964_v6 = vadd.f32 %v1963_v59, %v1951_v58  ;;  %v3094_v8 = vor.u32 %v4369_v3, %v3091_v4  ;;  %v3286_v15 = vor.u32 %v4417_v7, %v3283_v9  ;;  %v4489_v58 = vld [vmem:[#allocation2 + $0x464] sm:$0xf]  ;;  %v3571_v59 = vld [vmem:[#allocation2 + $0x478] sm:$0xf0] }
  0xf1   :  { %2201 = vmatpush.bf16.msrb.mxu0 %v3954_v12  ;;  %2170 = vmatmul.bf16.vlgmr.msra.gmra.mxu1 %v4861_v2  ;;  %v3763_v62 = vld [vmem:[#allocation2 + $0x5f8] sm:$0xf0]  ;;  %v3978_v3 = vor.u32 %v4594_v49, %v3977_v48  ;;  %v4615_v48 = vld [vmem:[#allocation2 + $0x854] sm:$0xf]  ;;  %v4075_v49 = vld [vmem:[#allocation2 + $0x868] sm:$0xf0] }
  0xf2   :  { %2214 = vmatpush.bf16.msrb.mxu1 %v4146_v13  ;;  %2183 = vmatmul.bf16.vlgmr.msra.gmra.mxu2 %v4868_v20  ;;  %v4558_v13 = vld [vmem:[#allocation2 + $0x684] sm:$0xf0]  ;;  %v3955_v0 = vld [vmem:[#allocation2 + $0x778] sm:$0xf0] }
  0xf3   :  { %2227 = vmatpush.bf16.msrb.mxu2 %v3190_v14  ;;  %2196 = vmatmul.bf16.vlgmr.msra.gmra.mxu3 %v4870_v21  ;;  %v4025_v14 = vld [vmem:[#allocation2 + $0x7f0] sm:$0xf]  ;;  %v4147_v7 = vld [vmem:[#allocation2 + $0x8f8] sm:$0xf0] }
  0xf4   :  { %2240 = vmatpush.bf16.msrb.mxu3 %v3382_v18  ;;  %v4606_v18 = vld [vmem:[#allocation2 + $0x804] sm:$0xf0] }
  0xf5   :  { %2202 = vmatpush.bf16.msrb.mxu0 %v3930_v26  ;;  %v1976_v12 = vpop.f32.mrf.mxu2  ;;  %v3834_v26 = vor.u32 %v4558_v13, %v3833_v39  ;;  %v3547_v39 = vld [vmem:[#allocation2 + $0x448] sm:$0xf0]  ;;  %v4531_v13 = vld [vmem:[#allocation2 + $0x5b4] sm:$0xf] }
  0xf6   :  { %2215 = vmatpush.bf16.msrb.mxu1 %v4122_v27  ;;  %v1977_v16 = vadd.f32 %v1976_v12, %v1964_v6  ;;  %v1989_v17 = vpop.f32.mrf.mxu3  ;;  %v1952_v27 = vpop.f32.mrf.mxu0  ;;  %v4633_v6 = vld [vmem:[#allocation2 + $0x8e4] sm:$0xf]  ;;  %v4483_v12 = vld [vmem:[#allocation2 + $0x434] sm:$0xf] }
  0xf7   :  { %2228 = vmatpush.bf16.msrb.mxu2 %v3166_v28  ;;  %v4026_v28 = vor.u32 %v4606_v18, %v4025_v14  ;;  %v1965_v34 = vpop.f32.mrf.mxu1  ;;  %v4150_v14 = vor.u32 %v4633_v6, %v4147_v7  ;;  %v4627_v18 = vld [vmem:[#allocation2 + $0x8b4] sm:$0xf]  ;;  %v3550_v22 = vor.u32 %v4483_v12, %v3547_v39  ;;  %v3523_v27 = vld [vmem:[#allocation2 + $0x418] sm:$0xf0]  ;;  %v3835_v39 = vld [vmem:[#allocation2 + $0x688] sm:$0xf0] }
  0xf8   :  { %2241 = vmatpush.bf16.msrb.mxu3 %v3358_v33  ;;  %v4920_v25 = vadd.f32 %v1989_v17, %v1977_v16  ;;  %v4001_v33 = vld [vmem:[#allocation2 + $0x7c0] sm:$0xf]  ;;  %v4579_v16 = vld [vmem:[#allocation2 + $0x734] sm:$0xf]  ;;  %v3931_v17 = vld [vmem:[#allocation2 + $0x748] sm:$0xf0] }
  0xf9   :  { %2203 = vmatpush.bf16.msrb.mxu0 %v3906_v41  ;;  %v4405_v41 = vld [vmem:[#allocation2 + $0x1c4] sm:$0xf]  ;;  %v4002_v46 = vor.u32 %v4600_v37, %v4001_v33  ;;  %v3934_v24 = vor.u32 %v4579_v16, %v3931_v17  ;;  %v3907_v33 = vld [vmem:[#allocation2 + $0x718] sm:$0xf0]  ;;  %v4459_v7 = vld [vmem:[#allocation2 + $0x374] sm:$0xf] }
  0xfa   :  { %2216 = vmatpush.bf16.msrb.mxu1 %v4098_v42  ;;  %v3235_v42 = vld [vmem:[#allocation2 + $0x1d8] sm:$0xf0]  ;;  %v4621_v34 = vld [vmem:[#allocation2 + $0x884] sm:$0xf]  ;;  %v4555_v12 = vld [vmem:[#allocation2 + $0x674] sm:$0xf] }
  0xfb   :  { %2229 = vmatpush.bf16.msrb.mxu2 %v3142_v43  ;;  %v3810_v43 = vor.u32 %v4552_v31, %v3809_v30  ;;  %v3238_v52 = vor.u32 %v4405_v41, %v3235_v42  ;;  %v3715_v30 = vld [vmem:[#allocation2 + $0x598] sm:$0xf0]  ;;  %v4573_v31 = vld [vmem:[#allocation2 + $0x704] sm:$0xf]  ;;  %v4471_v42 = vld [vmem:[#allocation2 + $0x3d4] sm:$0xf] }
  0xfc   :  { %2242 = vmatpush.bf16.msrb.mxu3 %v3334_v47  ;;  %v3046_v47 = vor.u32 %v4357_v38, %v3043_v40  ;;  %v366_v38 = vperm.slane %v4900_v55, 2  ;;  %v3910_v41 = vor.u32 %v4573_v31, %v3907_v33  ;;  %v3619_v31 = vld [vmem:[#allocation2 + $0x4d8] sm:$0xf0]  ;;  %v4549_v33 = vld [vmem:[#allocation2 + $0x644] sm:$0xf] }
  0xfd   :  { %2204 = vmatpush.bf16.msrb.mxu0 %v3882_v53  ;;  %v1978_v51 = vpop.f32.mrf.mxu2  ;;  %v3019_v53 = vld [vmem:[#allocation2 + $0x28] sm:$0xf0] }
  0xfe   :  { %2217 = vmatpush.bf16.msrb.mxu1 %v4074_v56  ;;  %v3211_v56 = vld [vmem:[#allocation2 + $0x1a8] sm:$0xf0]  ;;  %v3022_v4 = vor.u32 %v4351_v50, %v3019_v53 }
  0xff   :  { %2230 = vmatpush.bf16.msrb.mxu2 %v3118_v57  ;;  %v1991_v57 = vpop.f32.mrf.mxu3  ;;  %v3214_v9 = vor.u32 %v4399_v54, %v3211_v56  ;;  %v4465_v54 = vld [vmem:[#allocation2 + $0x3a4] sm:$0xf]  ;;  %v3475_v56 = vld [vmem:[#allocation2 + $0x3b8] sm:$0xf0] }
 0x100   :  { %2243 = vmatpush.bf16.msrb.mxu3 %v3310_v63  ;;  %v4585_v63 = vld [vmem:[#allocation2 + $0x764] sm:$0xf] }
 0x101   :  { %2205 = vmatpush.bf16.msrb.mxu0 %v3858_v10  ;;  %v3574_v10 = vor.u32 %v4489_v58, %v3571_v59  ;;  %v4513_v57 = vld [vmem:[#allocation2 + $0x524] sm:$0xf]  ;;  %v4078_v58 = vor.u32 %v4615_v48, %v4075_v49  ;;  %v3667_v59 = vld [vmem:[#allocation2 + $0x538] sm:$0xf0]  ;;  %v4591_v49 = vld [vmem:[#allocation2 + $0x794] sm:$0xf] }
 0x102   :  { %2218 = vmatpush.bf16.msrb.mxu1 %v4050_v11  ;;  %v3766_v11 = vor.u32 %v4537_v60, %v3763_v62  ;;  %v4561_v60 = vld [vmem:[#allocation2 + $0x6a4] sm:$0xf] }
 0x103   :  { %2231 = vmatpush.bf16.msrb.mxu2 %v3094_v8  ;;  %v3958_v8 = vor.u32 %v4585_v63, %v3955_v0  ;;  %v4609_v63 = vld [vmem:[#allocation2 + $0x824] sm:$0xf]  ;;  %v4051_v0 = vld [vmem:[#allocation2 + $0x838] sm:$0xf0] }
 0x104   :  { %2244 = vmatpush.bf16.msrb.mxu3 %v3286_v15  ;;  %v3739_v15 = vld [vmem:[#allocation2 + $0x5c8] sm:$0xf0] }
 0x105   :  { %2206 = vmatpush.bf16.msrb.mxu0 %v3834_v26  ;;  %v3742_v23 = vor.u32 %v4531_v13, %v3739_v15  ;;  %v4477_v26 = vld [vmem:[#allocation2 + $0x404] sm:$0xf]  ;;  %v4027_v15 = vld [vmem:[#allocation2 + $0x808] sm:$0xf0] }
 0x106   :  { %2219 = vmatpush.bf16.msrb.mxu1 %v4026_v28  ;;  %v4525_v28 = vld [vmem:[#allocation2 + $0x584] sm:$0xf]  ;;  %v3526_v37 = vor.u32 %v4477_v26, %v3523_v27  ;;  %v3427_v27 = vld [vmem:[#allocation2 + $0x358] sm:$0xf0] }
 0x107   :  { %2232 = vmatpush.bf16.msrb.mxu2 %v3070_v29  ;;  %v4126_v29 = vor.u32 %v4627_v18, %v4123_v19  ;;  %v3718_v40 = vor.u32 %v4525_v28, %v3715_v30  ;;  %v4453_v26 = vld [vmem:[#allocation2 + $0x344] sm:$0xf] }
 0x108   :  { %2245 = vmatpush.bf16.msrb.mxu3 %v3262_v35  ;;  %v4099_v35 = vld [vmem:[#allocation2 + $0x898] sm:$0xf0]  ;;  %v4501_v28 = vld [vmem:[#allocation2 + $0x4c4] sm:$0xf] }
 0x109   :  { %2207 = vmatpush.bf16.msrb.mxu0 %v3810_v43  ;;  %v3499_v43 = vld [vmem:[#allocation2 + $0x3e8] sm:$0xf0]  ;;  %v4102_v45 = vor.u32 %v4621_v34, %v4099_v35  ;;  %v3811_v34 = vld [vmem:[#allocation2 + $0x658] sm:$0xf0]  ;;  %v4597_v35 = vld [vmem:[#allocation2 + $0x7c4] sm:$0xf] }
 0x10a   :  { %2220 = vmatpush.bf16.msrb.mxu1 %v4002_v46  ;;  %v3691_v46 = vld [vmem:[#allocation2 + $0x568] sm:$0xf0]  ;;  %v3502_v51 = vor.u32 %v4471_v42, %v3499_v43  ;;  %v4447_v42 = vld [vmem:[#allocation2 + $0x314] sm:$0xf] }
 0x10b   :  { %2233 = vmatpush.bf16.msrb.mxu2 %v3046_v47  ;;  %v4567_v47 = vld [vmem:[#allocation2 + $0x6d4] sm:$0xf]  ;;  %v3694_v55 = vor.u32 %v4519_v44, %v3691_v46  ;;  %v3403_v43 = vld [vmem:[#allocation2 + $0x328] sm:$0xf0] }
 0x10c   :  { %2246 = vmatpush.bf16.msrb.mxu3 %v3238_v52  ;;  %v4495_v44 = vld [vmem:[#allocation2 + $0x494] sm:$0xf]  ;;  %v3595_v46 = vld [vmem:[#allocation2 + $0x4a8] sm:$0xf0] }
 0x10d   :  { %2208 = vmatpush.bf16.msrb.mxu0 %v3786_v61  ;;  %v2002_v50 = vpop.f32.mrf.mxu0  ;;  %v3859_v61 = vld [vmem:[#allocation2 + $0x6b8] sm:$0xf0] }
 0x10e   :  { %2221 = vmatpush.bf16.msrb.mxu1 %v3978_v3  ;;  %v2015_v52 = vpop.f32.mrf.mxu1  ;;  %v3478_v3 = vor.u32 %v4465_v54, %v3475_v56  ;;  %v3862_v6 = vor.u32 %v4561_v60, %v3859_v61 }
 0x10f   :  { %2234 = vmatpush.bf16.msrb.mxu2 %v3022_v4  ;;  %v3670_v4 = vor.u32 %v4513_v57, %v3667_v59  ;;  %v4936_v59 = vld [vmem:[%s5121_s2] sm:$0x3f] }
 0x110   :  { %2247 = vmatpush.bf16.msrb.mxu3 %v3214_v9  ;;  %2209 = vmatmul.bf16.vlgmr.msrb.gmra.mxu0 %v4877_v32  ;;  %v3451_v9 = vld [vmem:[#allocation2 + $0x388] sm:$0xf0]  ;;  %v367_v60 = vperm.slane %v4936_v59, 3 }
 0x111   :  { %2253 = vmatpush.bf16.msra.mxu0 %v3574_v10  ;;  %2222 = vmatmul.bf16.vlgmr.msrb.gmra.mxu1 %v4879_v36  ;;  %v4507_v10 = vld [vmem:[#allocation2 + $0x4f4] sm:$0xf]  ;;  %v3454_v19 = vor.u32 %v4459_v7, %v3451_v9 }
 0x112   :  { %2266 = vmatpush.bf16.msra.mxu1 %v3766_v11  ;;  %2235 = vmatmul.bf16.vlgmr.msrb.gmra.mxu2 %v4859_v1  ;;  %v3883_v1 = vld [vmem:[#allocation2 + $0x6e8] sm:$0xf0]  ;;  %v4054_v11 = vor.u32 %v4609_v63, %v4051_v0 }
 0x113   :  { %2279 = vmatpush.bf16.msra.mxu2 %v3958_v8  ;;  %2248 = vmatmul.bf16.vlgmr.msrb.gmra.mxu3 %v4861_v2  ;;  %v2003_v2 = vadd.f32 %v2002_v50, %v366_v38  ;;  %v3886_v53 = vor.u32 %v4567_v47, %v3883_v1  ;;  %v3643_v8 = vld [vmem:[#allocation2 + $0x508] sm:$0xf0]  ;;  %v3430_v38 = vor.u32 %v4453_v26, %v3427_v27  ;;  %v4543_v47 = vld [vmem:[#allocation2 + $0x614] sm:$0xf]  ;;  %v368_v26 = vperm.slane %v4936_v59, 4 }
 0x114   :  { %2292 = vmatpush.bf16.msra.mxu3 %v4150_v14  ;;  %v4603_v14 = vld [vmem:[#allocation2 + $0x7f4] sm:$0xf]  ;;  %v3787_v1 = vld [vmem:[#allocation2 + $0x628] sm:$0xf0] }
 0x115   :  { %2254 = vmatpush.bf16.msra.mxu0 %v3550_v22  ;;  %v2016_v62 = vadd.f32 %v2015_v52, %v2003_v2  ;;  %v2028_v13 = vpop.f32.mrf.mxu2  ;;  %v2004_v16 = vpop.f32.mrf.mxu0  ;;  %v4030_v30 = vor.u32 %v4603_v14, %v4027_v15  ;;  %v3979_v50 = vld [vmem:[#allocation2 + $0x7a8] sm:$0xf0]  ;;  %v3406_v2 = vor.u32 %v4447_v42, %v3403_v43  ;;  %v3598_v52 = vor.u32 %v4495_v44, %v3595_v46 }
 0x116   :  { %2267 = vmatpush.bf16.msra.mxu1 %v3742_v23  ;;  %v2041_v18 = vpop.f32.mrf.mxu3  ;;  %v2017_v22 = vpop.f32.mrf.mxu1  ;;  %v3646_v23 = vor.u32 %v4507_v10, %v3643_v8  ;;  %v4151_v42 = vmul.f32 -1.442695, %v4910_v5 }
 0x117   :  { %2280 = vmatpush.bf16.msra.mxu2 %v3934_v24  ;;  %v2029_v17 = vadd.f32 %v2028_v13, %v2016_v62  ;;  %v3838_v24 = vor.u32 %v4555_v12, %v3835_v39 }
 0x118   :  { %2293 = vmatpush.bf16.msra.mxu3 %v4126_v29 }
 0x119   :  { %2255 = vmatpush.bf16.msra.mxu0 %v3526_v37  ;;  %v2042_v29 = vadd.f32 %v2041_v18, %v2029_v17  ;;  %v4003_v37 = vld [vmem:[#allocation2 + $0x7d8] sm:$0xf0] }
 0x11a   :  { %2268 = vmatpush.bf16.msra.mxu1 %v3718_v40  ;;  %v3622_v40 = vor.u32 %v4501_v28, %v3619_v31 }
 0x11b   :  { %2281 = vmatpush.bf16.msra.mxu2 %v3910_v41  ;;  %v3814_v41 = vor.u32 %v4549_v33, %v3811_v34 }
 0x11c   :  { %2294 = vmatpush.bf16.msra.mxu3 %v4102_v45  ;;  %v4006_v45 = vor.u32 %v4597_v35, %v4003_v37 }
 0x11d   :  { %2256 = vmatpush.bf16.msra.mxu0 %v3502_v51  ;;  %v2030_v48 = vpop.f32.mrf.mxu2 }
 0x11e   :  { %2269 = vmatpush.bf16.msra.mxu1 %v3694_v55  ;;  %v2043_v51 = vpop.f32.mrf.mxu3  ;;  %v3790_v55 = vor.u32 %v4543_v47, %v3787_v1 }
 0x11f   :  { %2282 = vmatpush.bf16.msra.mxu2 %v3886_v53  ;;  %v3982_v53 = vor.u32 %v4591_v49, %v3979_v50  ;;  %v369_v50 = vperm.slane %v4936_v59, 5 }
 0x120   :  { %2295 = vmatpush.bf16.msra.mxu3 %v4078_v58 }
 0x121   :  { %2257 = vmatpush.bf16.msra.mxu0 %v3478_v3 }
 0x122   :  { %2270 = vmatpush.bf16.msra.mxu1 %v3670_v4 }
 0x123   :  { %2283 = vmatpush.bf16.msra.mxu2 %v3862_v6 }
 0x124   :  { %2296 = vmatpush.bf16.msra.mxu3 %v4054_v11 }
 0x125   :  { %2258 = vmatpush.bf16.msra.mxu0 %v3454_v19 }
 0x126   :  { %2271 = vmatpush.bf16.msra.mxu1 %v3646_v23 }
 0x127   :  { %2284 = vmatpush.bf16.msra.mxu2 %v3838_v24 }
 0x128   :  { %2297 = vmatpush.bf16.msra.mxu3 %v4030_v30 }
 0x129   :  { %2259 = vmatpush.bf16.msra.mxu0 %v3430_v38  ;;  %v4152_v38 = vmul.f32 -1.442695, %v4920_v25 }
 0x12a   :  { %2272 = vmatpush.bf16.msra.mxu1 %v3622_v40 }
 0x12b   :  { %2285 = vmatpush.bf16.msra.mxu2 %v3814_v41  ;;  %4694 = vpow2.f32 %v4152_v38 }
 0x12c   :  { %2298 = vmatpush.bf16.msra.mxu3 %v4006_v45  ;;  %4696 = vpow2.f32 %v4151_v42  ;;  %v4651_v42 = vld [vmem:[#allocation4 + $0x70] sm:$0xff] }
 0x12d   :  { %2260 = vmatpush.bf16.msra.mxu0 %v3406_v2  ;;  %v2054_v54 = vpop.f32.mrf.mxu0 }
 0x12e   :  { %2273 = vmatpush.bf16.msra.mxu1 %v3598_v52  ;;  %v2055_v56 = vadd.f32 %v2054_v54, %v2042_v29  ;;  %v2067_v57 = vpop.f32.mrf.mxu1 }
 0x12f   :  { %2286 = vmatpush.bf16.msra.mxu2 %v3790_v55 }
 0x130   :  { %2299 = vmatpush.bf16.msra.mxu3 %v3982_v53  ;;  %2261 = vmatmul.bf16.vlgmr.msra.gmra.mxu0 %v4868_v20  ;;  %v4931_v58 = vadd.f32 %v2067_v57, %v2055_v56 }
 0x131   :  { %2274 = vmatmul.bf16.vlgmr.msra.gmra.mxu1 %v4870_v21  ;;  %v4695_v48 = vpop.eup %4694 }
 0x132   :  { %2287 = vmatmul.bf16.vlgmr.msra.gmra.mxu2 %v4877_v32  ;;  %v4153_v43 = vmul.f32 -1.442695, %v4931_v58  ;;  %v4697_v49 = vpop.eup %4696  ;;  %v4950_v2 = vadd.f32 1.0, %v4695_v48 }
 0x133   :  { %2300 = vmatmul.bf16.vlgmr.msra.gmra.mxu3 %v4879_v36  ;;  %v4952_v52 = vadd.f32 1.0, %v4697_v49  ;;  %v4668_v49 = vld [vmem:[#allocation4 + $0xf8] sm:$0xff] }
 0x134   :  { %4698 = vpow2.f32 %v4153_v43  ;;  %vm2349_vm0 = vweird.f32 %v4950_v2  ;;  %2953 = vmatpush.bf16.msrb.mxu3 %v4668_v49 }
 0x135   :  { %v2080_v61 = vpop.f32.mrf.mxu2  ;;  %v2056_v21 = vpop.f32.mrf.mxu0  ;;  %vm2334_vm2 = vweird.f32 %v4952_v52 }
 0x136   :  { %v2081_v20 = vadd.f32 %v2080_v61, %v367_v60  ;;  %v2093_v62 = vpop.f32.mrf.mxu3  ;;  %v2069_v63 = vpop.f32.mrf.mxu1 }
 0x138   :  { %v2094_v32 = vadd.f32 %v2093_v62, %v2081_v20 }
 0x13a   :  { %v4699_v51 = vpop.eup %4698 }
 0x13b   :  { %v4954_v53 = vadd.f32 1.0, %v4699_v51 }
 0x13d   :  { %v2082_v0 = vpop.f32.mrf.mxu2  ;;  %vm2364_vm5 = vweird.f32 %v4954_v53  ;;  %v2370_v51 = vand.u32 2147483648, %v4954_v53 }
 0x13e   :  { %v2095_v36 = vpop.f32.mrf.mxu3 }
 0x14d   :  { %v2106_v3 = vpop.f32.mrf.mxu0 }
 0x14e   :  { %v2107_v4 = vadd.f32 %v2106_v3, %v2094_v32  ;;  %v2119_v6 = vpop.f32.mrf.mxu1 }
 0x150   :  { %v2120_v7 = vadd.f32 %v2119_v6, %v2107_v4 }
 0x155   :  { %v2132_v9 = vpop.f32.mrf.mxu2  ;;  %v2108_v12 = vpop.f32.mrf.mxu0 }
 0x156   :  { %v2133_v10 = vadd.f32 %v2132_v9, %v2120_v7  ;;  %v2145_v11 = vpop.f32.mrf.mxu3  ;;  %v2121_v39 = vpop.f32.mrf.mxu1 }
 0x158   :  { %v4939_v8 = vadd.f32 %v2145_v11, %v2133_v10 }
 0x15a   :  { %v4154_v45 = vmul.f32 -1.442695, %v4939_v8 }
 0x15c   :  { %4700 = vpow2.f32 %v4154_v45 }
 0x15d   :  { %v2134_v13 = vpop.f32.mrf.mxu2 }
 0x15e   :  { %v2147_v14 = vpop.f32.mrf.mxu3 }
 0x162   :  { %v4701_v55 = vpop.eup %4700 }
 0x163   :  { %v4958_v57 = vadd.f32 1.0, %v4701_v55  ;;  %v2368_v55 = vand.u32 2147483647, %v4954_v53 }
 0x165   :  { %vm2379_vm10 = vweird.f32 %v4958_v57 }
 0x16d   :  { %v2158_v15 = vpop.f32.mrf.mxu0 }
 0x16e   :  { %v2171_v16 = vpop.f32.mrf.mxu1  ;;  %v2159_v27 = vadd.f32 %v2158_v15, %v368_v26 }
 0x170   :  { %v2172_v28 = vadd.f32 %v2171_v16, %v2159_v27 }
 0x175   :  { %v2184_v17 = vpop.f32.mrf.mxu2  ;;  %v2160_v18 = vpop.f32.mrf.mxu0 }
 0x176   :  { %v2197_v19 = vpop.f32.mrf.mxu3  ;;  %v2173_v22 = vpop.f32.mrf.mxu1  ;;  %v2185_v30 = vadd.f32 %v2184_v17, %v2172_v28  ;;  %v2340_v28 = vand.u32 2147483648, %v4952_v52 }
 0x178   :  { %v2198_v33 = vadd.f32 %v2197_v19, %v2185_v30 }
 0x17d   :  { %v2186_v23 = vpop.f32.mrf.mxu2 }
 0x17e   :  { %v2199_v24 = vpop.f32.mrf.mxu3 }
 0x18d   :  { %v2210_v29 = vpop.f32.mrf.mxu0 }
 0x18e   :  { %v2223_v31 = vpop.f32.mrf.mxu1  ;;  %v2211_v40 = vadd.f32 %v2210_v29, %v2198_v33  ;;  %v2353_v33 = vand.u32 2147483647, %v4950_v2 }
 0x190   :  { %v4945_v44 = vadd.f32 %v2223_v31, %v2211_v40  ;;  %v4644_v40 = vld [vmem:[#allocation4 + $0x38] sm:$0xff]  ;;  %vm2354_vm8 = vcmp.eq.f32.partialorder %v2353_v33, 8.507059e+37 }
 0x191   :  { %2914 = vmatpush.bf16.msrb.mxu0 %v4644_v40 }
 0x192   :  { %v4155_v1 = vmul.f32 -1.442695, %v4945_v44 }
 0x194   :  { %4702 = vpow2.f32 %v4155_v1 }
 0x195   :  { %v2236_v34 = vpop.f32.mrf.mxu2  ;;  %v2212_v37 = vpop.f32.mrf.mxu0  ;;  %4704 = vrcp.f32 %v4950_v2 }
 0x196   :  { %v2249_v35 = vpop.f32.mrf.mxu3  ;;  %v2225_v41 = vpop.f32.mrf.mxu1  ;;  %v2237_v54 = vadd.f32 %v2236_v34, %v369_v50  ;;  %4706 = vrcp.f32 %v4952_v52  ;;  %v2355_v34 = vand.u32 2147483648, %v4950_v2 }
 0x197   :  { %4708 = vrcp.f32 %v4954_v53  ;;  %v4652_v41 = vld [vmem:[#allocation4 + $0x78] sm:$0xff] }
 0x198   :  { %v2250_v60 = vadd.f32 %v2249_v35, %v2237_v54  ;;  %4710 = vrcp.f32 %v4958_v57  ;;  %2927 = vmatpush.bf16.msrb.mxu1 %v4652_v41  ;;  %v2356_v50 = vor.u32 1.1754944e-38, %v2355_v34  ;;  %v4643_v41 = vld [vmem:[#allocation4 + $0x30] sm:$0xff] }
 0x199   :  { %2915 = vmatpush.bf16.msrb.mxu0 %v4643_v41  ;;  %v4678_v41 = vld [vmem:[#allocation4 + $0x148] sm:$0xff] }
 0x19a   :  { %v4703_v56 = vpop.eup %4702 }
 0x19b   :  { %v4961_v61 = vadd.f32 1.0, %v4703_v56  ;;  %v4963_v21 = vpop.eup %4704 }
 0x19c   :  { %v4966_v63 = vpop.eup %4706  ;;  %v2345_v0 = vmul.f32 %v4963_v21, %v4950_v2  ;;  %vm2350_vm1 = vweird.f32 %v4963_v21  ;;  %2928 = vmatpush.bf16.msrb.mxu1 %v4651_v42  ;;  %v4669_v42 = vld [vmem:[#allocation4 + $0x100] sm:$0xff] }
 0x19d   :  { %v2238_v46 = vpop.f32.mrf.mxu2  ;;  %4712 = vrcp.f32 %v4961_v61  ;;  %v4969_v32 = vpop.eup %4708  ;;  %v2330_v4 = vmul.f32 %v4966_v63, %v4952_v52  ;;  %vm2335_vm3 = vweird.f32 %v4966_v63  ;;  %vm5001_vm4 = vmor %vm2349_vm0, %vm2350_vm1  ;;  %vm2394_vm12 = vweird.f32 %v4961_v61 }
 0x19e   :  { %v2251_v47 = vpop.f32.mrf.mxu3  ;;  %v4975_v10 = vpop.eup %4710  ;;  %v2360_v11 = vmul.f32 %v4969_v32, %v4954_v53  ;;  %v2346_v39 = vsub.f32 1.0, %v2345_v0  ;;  %vm2365_vm6 = vweird.f32 %v4969_v32  ;;  %v2338_v46 = vand.u32 2147483647, %v4952_v52  ;;  %vm5019_vm7 = vmor %vm2334_vm2, %vm2335_vm3 }
 0x19f   :  { %v2331_v15 = vsub.f32 1.0, %v2330_v4  ;;  %v2375_v16 = vmul.f32 %v4975_v10, %v4958_v57  ;;  %v2341_v47 = vor.u32 1.1754944e-38, %v2340_v28  ;;  %vm5025_vm9 = vmor %vm2364_vm5, %vm2365_vm6  ;;  %vm2380_vm11 = vweird.f32 %v4975_v10 }
 0x1a0   :  { %v2361_v18 = vsub.f32 1.0, %v2360_v11  ;;  %v2347_v19 = vmul.f32 %v4963_v21, %v2346_v39  ;;  %vm2339_vm14 = vcmp.eq.f32.partialorder %v2338_v46, 8.507059e+37  ;;  %vm5044_vm15 = vmor %vm2379_vm10, %vm2380_vm11  ;;  %vm2369_vm0 = vcmp.eq.f32.partialorder %v2368_v55, 8.507059e+37  ;;  %v4659_v55 = vld [vmem:[#allocation4 + $0xb0] sm:$0xff] }
 0x1a1   :  { %v2332_v24 = vmul.f32 %v4966_v63, %v2331_v15  ;;  %v2376_v26 = vsub.f32 1.0, %v2375_v16  ;;  %v4806_v46 = vmov 768.0  }
 0x1a2   :  { %v2362_v29 = vmul.f32 %v4969_v32, %v2361_v18  ;;  %v2348_v30 = vadd.f32 %v4963_v21, %v2347_v19 }
 0x1a3   :  { %v4981_v14 = vpop.eup %4712  ;;  %v2333_v37 = vadd.f32 %v4966_v63, %v2332_v24  ;;  %v2377_v38 = vmul.f32 %v4975_v10, %v2376_v26 }
 0x1a4   :  { %v2390_v22 = vmul.f32 %v4981_v14, %v4961_v61  ;;  %v2363_v43 = vadd.f32 %v4969_v32, %v2362_v29  ;;  %v2352_v1 = vsel %vm5001_vm4, %v4963_v21, %v2348_v30  ;;  %vm2395_vm13 = vweird.f32 %v4981_v14  ;;  %v4646_v21 = vld [vmem:[#allocation4 + $0x48] sm:$0xff] }
 0x1a5   :  { %v2378_v54 = vadd.f32 %v4975_v10, %v2377_v38  ;;  %v2337_v52 = vsel %vm5019_vm7, %v4966_v63, %v2333_v37  ;;  %v2357_v56 = vsel %vm2354_vm8, %v2356_v50, %v2352_v1  ;;  %v2400_v63 = vand.u32 2147483648, %v4961_v61  ;;  %vm2396_vm1 = vmor %vm2394_vm12, %vm2395_vm13  ;;  %v4649_v1 = vld [vmem:[#allocation4 + $0x60] sm:$0xff]  ;;  %v4640_v50 = vld [vmem:[#allocation4 + $0x18] sm:$0xff] }
 0x1a6   :  { %v2391_v31 = vsub.f32 1.0, %v2390_v22  ;;  %v2342_v0 = vsel %vm2339_vm14, %v2341_v47, %v2337_v52  ;;  %v4641_v47 = vld [vmem:[#allocation4 + $0x20] sm:$0xff] }
 0x1a7   :  { %v5059_v11 = vmul.f32 %v2342_v0, %v4910_v5  ;;  %v2401_v39 = vor.u32 1.1754944e-38, %v2400_v63  ;;  %v4657_v63 = vld [vmem:[#allocation4 + $0xa0] sm:$0xff] }
 0x1a8   :  { %v2392_v48 = vmul.f32 %v4981_v14, %v2391_v31  ;;  %v4665_v0 = vld [vmem:[#allocation4 + $0xe0] sm:$0xff] }
 0x1aa   :  { %v2393_v53 = vadd.f32 %v4981_v14, %v2392_v48  ;;  %v4660_v48 = vld [vmem:[#allocation4 + $0xb8] sm:$0xff] }
 0x1ab   :  { %2940 = vmatpush.bf16.msrb.mxu2 %v4660_v48  ;;  %v2480_v48 = vld [vmem:[%s5122_s3] sm:$0x3f] }
 0x1ad   :  { %v2262_v59 = vpop.f32.mrf.mxu0 }
 0x1ae   :  { %v2275_v20 = vpop.f32.mrf.mxu1  ;;  %v2263_v62 = vadd.f32 %v2262_v59, %v2250_v60  ;;  %v2367_v60 = vsel %vm5025_vm9, %v4969_v32, %v2363_v43  ;;  %v2385_v59 = vand.u32 2147483648, %v4958_v57  ;;  %v2398_v32 = vand.u32 2147483647, %v4961_v61  ;;  %v4642_v43 = vld [vmem:[#allocation4 + $0x28] sm:$0xff] }
 0x1af   :  { %2916 = vmatpush.bf16.msrb.mxu0 %v4642_v43  ;;  %2941 = vmatpush.bf16.msrb.mxu2 %v4659_v55  ;;  %v4677_v43 = vld [vmem:[#allocation4 + $0x140] sm:$0xff] }
 0x1b0   :  { %v2276_v36 = vadd.f32 %v2275_v20, %v2263_v62  ;;  %v2383_v20 = vand.u32 2147483647, %v4958_v57  ;;  %v2371_v62 = vor.u32 1.1754944e-38, %v2370_v51  ;;  %v2382_v57 = vsel %vm5044_vm15, %v4975_v10, %v2378_v54  ;;  %v4648_v51 = vld [vmem:[#allocation4 + $0x58] sm:$0xff]  ;;  %v4667_v54 = vld [vmem:[#allocation4 + $0xf0] sm:$0xff] }
 0x1b1   :  { %vm2399_vm3 = vcmp.eq.f32.partialorder %v2398_v32, 8.507059e+37  ;;  %2954 = vmatpush.bf16.msrb.mxu3 %v4667_v54  ;;  %v4637_v32 = vld [vmem:[#allocation4] sm:$0xff] }
 0x1b2   :  { %v2372_v4 = vsel %vm2369_vm0, %v2371_v62, %v2367_v60  ;;  %vm2384_vm2 = vcmp.eq.f32.partialorder %v2383_v20, 8.507059e+37  ;;  %v4647_v60 = vld [vmem:[#allocation4 + $0x50] sm:$0xff]  ;;  %v4666_v20 = vld [vmem:[#allocation4 + $0xe8] sm:$0xff] }
 0x1b3   :  { %v5062_v10 = vmul.f32 %v2372_v4, %v4931_v58  ;;  %2917 = vmatpush.bf16.msrb.mxu0 %v4641_v47  ;;  %v4638_v62 = vld [vmem:[#allocation4 + $0x8] sm:$0xff]  ;;  %v4656_v4 = vld [vmem:[#allocation4 + $0x98] sm:$0xff] }
 0x1b5   :  { %v2288_v3 = vpop.f32.mrf.mxu2  ;;  %v2264_v9 = vpop.f32.mrf.mxu0  ;;  %2955 = vmatpush.bf16.msrb.mxu3 %v4666_v20  ;;  %v2484_v20 = vperm.slane %v2480_v48, 2 }
 0x1b6   :  { %v2289_v6 = vadd.f32 %v2288_v3, %v2276_v36  ;;  %v2301_v7 = vpop.f32.mrf.mxu3  ;;  %v2277_v12 = vpop.f32.mrf.mxu1  ;;  %v5054_v3 = vmul.f32 %v2357_v56, %v4920_v25  ;;  %v4639_v56 = vld [vmem:[#allocation4 + $0x10] sm:$0xff] }
 0x1b7   :  { %2918 = vmatpush.bf16.msrb.mxu0 %v4640_v50  ;;  %v2500_v50 = vld [vmem:[%s5123_s4] sm:$0x3f] }
 0x1b8   :  { %v4979_v13 = vadd.f32 %v2301_v7, %v2289_v6  ;;  %v2386_v6 = vor.u32 1.1754944e-38, %v2385_v59  ;;  %v2397_v7 = vsel %vm2396_vm1, %v4981_v14, %v2393_v53  ;;  %v2425_v25 = vadd.f32 %v5054_v3, %v5059_v11  ;;  %v4658_v59 = vld [vmem:[#allocation4 + $0xa8] sm:$0xff] }
 0x1b9   :  { %v2402_v15 = vsel %vm2399_vm3, %v2401_v39, %v2397_v7  ;;  %2942 = vmatpush.bf16.msrb.mxu2 %v4658_v59  ;;  %2956 = vmatpush.bf16.msrb.mxu3 %v4665_v0  ;;  %v4676_v7 = vld [vmem:[#allocation4 + $0x138] sm:$0xff]  ;;  %v4655_v39 = vld [vmem:[#allocation4 + $0x90] sm:$0xff]  ;;  %v2483_v59 = vperm.slane %v2480_v48, 1 }
 0x1ba   :  { %v4156_v17 = vmul.f32 -1.442695, %v4979_v13  ;;  %v2387_v12 = vsel %vm2384_vm2, %v2386_v6, %v2382_v57  ;;  %v5072_v18 = vmul.f32 %v2402_v15, %v4945_v44  ;;  %v2426_v19 = vadd.f32 %v2425_v25, %v5062_v10  ;;  %v4664_v6 = vld [vmem:[#allocation4 + $0xd8] sm:$0xff]  ;;  %v4675_v25 = vld [vmem:[#allocation4 + $0x130] sm:$0xff] }
 0x1bb   :  { %v5068_v14 = vmul.f32 %v2387_v12, %v4939_v8  ;;  %v2442_v44 = vmul.f32 %v5062_v10, %v5062_v10  ;;  %2919 = vmatpush.bf16.msrb.mxu0 %v4639_v56 }
 0x1bc   :  { %4714 = vpow2.f32 %v4156_v17  ;;  %v2444_v34 = vmul.f32 %v5072_v18, %v5072_v18 }
 0x1bd   :  { %v2290_v23 = vpop.f32.mrf.mxu2  ;;  %v2427_v8 = vadd.f32 %v2426_v19, %v5068_v14  ;;  %v2443_v31 = vmul.f32 %v5068_v14, %v5068_v14  ;;  %2943 = vmatpush.bf16.msrb.mxu2 %v4657_v63  ;;  %2957 = vmatpush.bf16.msrb.mxu3 %v4664_v6  ;;  %v4674_v19 = vld [vmem:[#allocation4 + $0x128] sm:$0xff]  ;;  %v2505_v63 = vperm.slane %v2500_v50, 3 }
 0x1be   :  { %v2303_v27 = vpop.f32.mrf.mxu3  ;;  %v2441_v23 = vmul.f32 %v5054_v3, %v5054_v3 }
 0x1bf   :  { %v2440_v27 = vmul.f32 %v5059_v11, %v5059_v11  ;;  %v2428_v29 = vadd.f32 %v2427_v8, %v5072_v18  ;;  %2920 = vmatpush.bf16.msrb.mxu0 %v4638_v62  ;;  %v4661_v8 = vld [vmem:[#allocation4 + $0xc0] sm:$0xff] }
 0x1c1   :  { %v2446_v30 = vadd.f32 %v2441_v23, %v2440_v27  ;;  %2944 = vmatpush.bf16.msrb.mxu2 %v4656_v4  ;;  %v4681_v27 = vld [vmem:[#allocation4 + $0x160] sm:$0xff] }
 0x1c2   :  { %v4715_v35 = vpop.eup %4714 }
 0x1c3   :  { %v5008_v45 = vadd.f32 1.0, %v4715_v35  ;;  %v2447_v35 = vadd.f32 %v2446_v30, %v2442_v44  ;;  %2921 = vmatpush.bf16.msrb.mxu0 %v4637_v32 }
 0x1c5   :  { %4716 = vrcp.f32 %v5008_v45  ;;  %v2415_v16 = vand.u32 2147483648, %v5008_v45  ;;  %v2413_v5 = vand.u32 2147483647, %v5008_v45  ;;  %vm2409_vm5 = vweird.f32 %v5008_v45  ;;  %2945 = vmatpush.bf16.msrb.mxu2 %v4655_v39 }
 0x1c6   :  { %v2448_v38 = vadd.f32 %v2447_v35, %v2443_v31  ;;  %4718 = vrcp.f32 %v4806_v46 }
 0x1c7   :  { %v2416_v22 = vor.u32 1.1754944e-38, %v2415_v16  ;;  %vm2414_vm7 = vcmp.eq.f32.partialorder %v2413_v5, 8.507059e+37  ;;  %2966 = vmatpush.bf16.msra.mxu0 %v4676_v7  ;;  %v4683_v16 = vld [vmem:[#allocation4 + $0x170] sm:$0xff]  ;;  %v4654_v5 = vld [vmem:[#allocation4 + $0x88] sm:$0xff] }
 0x1c8   :  { %v2449_v40 = vadd.f32 %v2448_v38, %v2444_v34  ;;  %v4680_v34 = vld [vmem:[#allocation4 + $0x158] sm:$0xff]  ;;  %v4679_v38 = vld [vmem:[#allocation4 + $0x150] sm:$0xff] }
 0x1c9   :  { %2946 = vmatpush.bf16.msrb.mxu2 %v4654_v5 }
 0x1cb   :  { %v4717_v36 = vpop.eup %4716  ;;  %2967 = vmatpush.bf16.msra.mxu0 %v4675_v25 }
 0x1cc   :  { %v2405_v9 = vmul.f32 %v4717_v36, %v5008_v45  ;;  %vm2410_vm4 = vweird.f32 %v4717_v36  ;;  %v4650_v45 = vld [vmem:[#allocation4 + $0x68] sm:$0xff]  ;;  %v4719_v2 = vpop.eup %4718 }
 0x1cd   :  { %vm2411_vm6 = vmor %vm2409_vm5, %vm2410_vm4  ;;  %2929 = vmatpush.bf16.msrb.mxu1 %v4650_v45  ;;  %v2433_v52 = vmul.f32 768.0, %v4719_v2  ;;  %vm2437_vm8 = vweird.f32 %v4719_v2 }
 0x1ce   :  { %v2406_v61 = vsub.f32 1.0, %v2405_v9  ;;  %v4684_v9 = vld [vmem:[#allocation4 + $0x178] sm:$0xff] }
 0x1cf   :  { %v2434_v53 = vsub.f32 1.0, %v2433_v52  ;;  %2968 = vmatpush.bf16.msra.mxu0 %v4674_v19  ;;  %v2482_v52 = vperm.slane %v2480_v48, 0 }
 0x1d0   :  { %v2407_v17 = vmul.f32 %v4717_v36, %v2406_v61  ;;  %v4663_v61 = vld [vmem:[#allocation4 + $0xd0] sm:$0xff] }
 0x1d1   :  { %2930 = vmatpush.bf16.msrb.mxu1 %v4649_v1  ;;  %v2435_v57 = vmul.f32 %v4719_v2, %v2434_v53  ;;  %2958 = vmatpush.bf16.msrb.mxu3 %v4663_v61  ;;  %v2485_v53 = vperm.slane %v2480_v48, 3 }
 0x1d2   :  { %v2408_v58 = vadd.f32 %v4717_v36, %v2407_v17 }
 0x1d3   :  { %v2436_v12 = vadd.f32 %v4719_v2, %v2435_v57 }
 0x1d4   :  { %v2412_v24 = vsel %vm2411_vm6, %v4717_v36, %v2408_v58  ;;  %v4645_v36 = vld [vmem:[#allocation4 + $0x40] sm:$0xff]  ;;  %v4662_v58 = vld [vmem:[#allocation4 + $0xc8] sm:$0xff] }
 0x1d5   :  { %v2417_v26 = vsel %vm2414_vm7, %v2416_v22, %v2412_v24  ;;  %2931 = vmatpush.bf16.msrb.mxu1 %v4648_v51  ;;  %v2438_v17 = vsel %vm2437_vm8, %v4719_v2, %v2436_v12  ;;  %v4682_v22 = vld [vmem:[#allocation4 + $0x168] sm:$0xff]  ;;  %2959 = vmatpush.bf16.msrb.mxu3 %v4662_v58  ;;  %v4653_v24 = vld [vmem:[#allocation4 + $0x80] sm:$0xff]  ;;  %v2486_v58 = vperm.slane %v2480_v48, 4 }
 0x1d6   :  { %v5084_v28 = vmul.f32 %v2417_v26, %v4979_v13  ;;  %v4673_v26 = vld [vmem:[#allocation4 + $0x120] sm:$0xff]  ;;  %2947 = vmatpush.bf16.msrb.mxu2 %v4653_v24 }
 0x1d7   :  { %2969 = vmatpush.bf16.msra.mxu0 %v4673_v26 }
 0x1d8   :  { %v2429_v33 = vadd.f32 %v2428_v29, %v5084_v28  ;;  %v2445_v37 = vmul.f32 %v5084_v28, %v5084_v28 }
 0x1d9   :  { %2932 = vmatpush.bf16.msrb.mxu1 %v4647_v60  ;;  %2960 = vmatpush.bf16.msrb.mxu3 %v4661_v8  ;;  %v2502_v60 = vperm.slane %v2500_v50, 0  ;;  %v2506_v8 = vperm.slane %v2500_v50, 4 }
 0x1da   :  { %2430 = vadd.xlane.f32.xlu0 %v2429_v33  ;;  %v2450_v13 = vadd.f32 %v2449_v40, %v2445_v37  ;;  %v4672_v33 = vld [vmem:[#allocation4 + $0x118] sm:$0xff]  ;;  %v4671_v37 = vld [vmem:[#allocation4 + $0x110] sm:$0xff] }
 0x1db   :  { %2970 = vmatpush.bf16.msra.mxu0 %v4672_v33 }
 0x1dd   :  { %2933 = vmatpush.bf16.msrb.mxu1 %v4646_v21  ;;  %v2503_v21 = vperm.slane %v2500_v50, 1 }
 0x1df   :  { %2971 = vmatpush.bf16.msra.mxu0 %v4671_v37 }
 0x1e1   :  { %2934 = vmatpush.bf16.msrb.mxu1 %v4645_v36 }
 0x1e2   :  { %2451 = vadd.xlane.f32.xlu0 %v2450_v13  ;;  %v4670_v13 = vld [vmem:[#allocation4 + $0x108] sm:$0xff] }
 0x1e3   :  { %2972 = vmatpush.bf16.msra.mxu0 %v4670_v13 }
 0x1e5   :  { %2979 = vmatpush.bf16.msra.mxu1 %v4684_v9 }
 0x1e7   :  { %2973 = vmatpush.bf16.msra.mxu0 %v4669_v42 }
 0x1e9   :  { %2980 = vmatpush.bf16.msra.mxu1 %v4683_v16 }
 0x1ed   :  { %2981 = vmatpush.bf16.msra.mxu1 %v4682_v22  ;;  %v2487_v22 = vperm.slane %v2480_v48, 5 }
 0x1f1   :  { %2982 = vmatpush.bf16.msra.mxu1 %v4681_v27  ;;  %v2507_v27 = vperm.slane %v2500_v50, 5 }
 0x1f5   :  { %2983 = vmatpush.bf16.msra.mxu1 %v4680_v34  ;;  %v4693_v34 = vld [vmem:[#allocation6] ss:$0 sm:$0xff] }
 0x1f9   :  { %2984 = vmatpush.bf16.msra.mxu1 %v4679_v38 }
 0x1fd   :  { %2985 = vmatpush.bf16.msra.mxu1 %v4678_v41 }
 0x201   :  { %2986 = vmatpush.bf16.msra.mxu1 %v4677_v43 }
 0x24d   :  { %v2431_v15 = vpop.xlane.xlu0 %2430 }
 0x24e   :  { %v5094_v23 = vmul.f32 %v2438_v17, %v2431_v15 }
 0x250   :  { %v2454_v29 = vmul.f32 %v5094_v23, %v5094_v23  ;;  %v2457_v51 = vsub.f32 %v5059_v11, %v5094_v23  ;;  %v2458_v2 = vsub.f32 %v5054_v3, %v5094_v23  ;;  %v2459_v55 = vsub.f32 %v5062_v10, %v5094_v23 }
 0x251   :  { %v2460_v56 = vsub.f32 %v5068_v14, %v5094_v23  ;;  %v2504_v11 = vperm.slane %v2500_v50, 2  ;;  %v2461_v16 = vsub.f32 %v5072_v18, %v5094_v23 }
 0x255   :  { %v2452_v44 = vpop.xlane.xlu0 %2451 }
 0x256   :  { %v2453_v30 = vmul.f32 %v2452_v44, %v2438_v17  ;;  %v2462_v17 = vsub.f32 %v5084_v28, %v5094_v23 }
 0x258   :  { %v2455_v31 = vsub.f32 %v2453_v30, %v2454_v29 }
 0x25a   :  { %v2456_v35 = vmax.f32 %v2455_v31, 0.0 }
 0x25c   :  { %v2463_v40 = vadd.f32 1e-05, %v2456_v35 }
 0x25e   :  { %4720 = vrsqrt.f32 %v2463_v40  ;;  %vm2470_vm10 = vweird.f32 %v2463_v40 }
 0x264   :  { %v4721_v45 = vpop.eup %4720 }
 0x265   :  { %v2465_v46 = vmul.f32 %v4721_v45, %v2463_v40  ;;  %vm2471_vm9 = vweird.f32 %v4721_v45 }
 0x266   :  { %vm2472_vm11 = vmor %vm2470_vm10, %vm2471_vm9 }
 0x267   :  { %v2466_v47 = vmul.f32 %v4721_v45, %v2465_v46 }
 0x269   :  { %v2467_v1 = vmul.f32 0.5, %v2466_v47 }
 0x26b   :  { %v2468_v49 = vsub.f32 1.5, %v2467_v1 }
 0x26d   :  { %v2469_v54 = vmul.f32 %v4721_v45, %v2468_v49 }
 0x26f   :  { %v2473_v62 = vsel %vm2472_vm11, %v4721_v45, %v2469_v54 }
 0x270   :  { %v2474_v0 = vmul.f32 %v2473_v62, %v2457_v51  ;;  %v2475_v3 = vmul.f32 %v2473_v62, %v2458_v2  ;;  %v2476_v57 = vmul.f32 %v2473_v62, %v2459_v55  ;;  %v2477_v32 = vmul.f32 %v2473_v62, %v2460_v56 }
 0x271   :  { %v2478_v5 = vmul.f32 %v2473_v62, %v2461_v16  ;;  %v2479_v19 = vmul.f32 %v2473_v62, %v2462_v17 }
 0x272   :  { %v2494_v10 = vmul.f32 %v2482_v52, %v2474_v0  ;;  %v2495_v36 = vmul.f32 %v2483_v59, %v2475_v3  ;;  %v2496_v4 = vmul.f32 %v2484_v20, %v2476_v57  ;;  %v2497_v6 = vmul.f32 %v2485_v53, %v2477_v32 }
 0x273   :  { %v2498_v24 = vmul.f32 %v2486_v58, %v2478_v5  ;;  %v2499_v26 = vmul.f32 %v2487_v22, %v2479_v19 }
 0x274   :  { %v2514_v7 = vadd.f32 %v2502_v60, %v2494_v10  ;;  %v2515_v9 = vadd.f32 %v2503_v21, %v2495_v36  ;;  %v2516_v14 = vadd.f32 %v2504_v11, %v2496_v4  ;;  %v2517_v12 = vadd.f32 %v2505_v63, %v2497_v6 }
 0x275   :  { %v2518_v44 = vadd.f32 %v2506_v8, %v2498_v24  ;;  %v2519_v29 = vadd.f32 %v2507_v27, %v2499_v26 }
 0x276   :  { %v2520_v39 = vpack.c.bf16 %v2514_v7, %v2514_v7  ;;  %v2521_v61 = vpack.c.bf16 %v2515_v9, %v2515_v9  ;;  %v2522_v25 = vpack.c.bf16 %v2516_v14, %v2516_v14  ;;  %v2523_v15 = vpack.c.bf16 %v2517_v12, %v2517_v12 }
 0x277   :  { %v2524_v30 = vpack.c.bf16 %v2518_v44, %v2518_v44  ;;  %v2525_v31 = vpack.c.bf16 %v2519_v29, %v2519_v29 }
 0x278   :  { %2922 = vmatmul.bf16.vlgmr.msrb.gmra.mxu0 %v2520_v39  ;;  %2935 = vmatmul.bf16.vlgmr.msrb.gmra.mxu1 %v2521_v61 }
 0x279   :  { %2948 = vmatmul.bf16.vlgmr.msrb.gmra.mxu2 %v2522_v25  ;;  %2961 = vmatmul.bf16.vlgmr.msrb.gmra.mxu3 %v2523_v15 }
 0x288   :  { %2974 = vmatmul.bf16.vlgmr.msra.gmra.mxu0 %v2524_v30  ;;  %2987 = vmatmul.bf16.vlgmr.msra.gmra.mxu1 %v2525_v31 }
 0x2f5   :  { %v2923_v18 = vpop.f32.mrf.mxu0  ;;  %v2936_v33 = vpop.f32.mrf.mxu1 }
 0x2f6   :  { %v2924_v28 = vadd.f32 %v4693_v34, %v2923_v18 }
 0x2f8   :  { %v2937_v40 = vadd.f32 %v2936_v33, %v2924_v28 }
 0x2fc   :  { %v2949_v23 = vpop.f32.mrf.mxu2  ;;  %v2962_v35 = vpop.f32.mrf.mxu3 }
 0x2fd   :  { %v2925_v37 = vpop.f32.mrf.mxu0  ;;  %v2938_v38 = vpop.f32.mrf.mxu1  ;;  %v2950_v13 = vadd.f32 %v2949_v23, %v2937_v40 }
 0x2ff   :  { %v2963_v41 = vadd.f32 %v2962_v35, %v2950_v13 }
 0x304   :  { %v2951_v42 = vpop.f32.mrf.mxu2  ;;  %v2964_v43 = vpop.f32.mrf.mxu3 }
 0x305   :  { %v2975_v45 = vpop.f32.mrf.mxu0  ;;  %v2988_v46 = vpop.f32.mrf.mxu1 }
 0x306   :  { %v2976_v47 = vadd.f32 %v2975_v45, %v2963_v41 }
 0x308   :  { %v2989_v1 = vadd.f32 %v2988_v46, %v2976_v47 }
 0x30a   :  { %2992 = vst [vmem:[%s5126_s7] sm:$0xff] %v2989_v1 }
 0x30d   :  { %v2977_v48 = vpop.f32.mrf.mxu0  ;;  %v2990_v49 = vpop.f32.mrf.mxu1 }
 0x30e   :  { %2997 = vsyncpa [#allocation3], 1 }
 0x30f   :  { %2998 = vsyncpa [#allocation5], 1 }

</bundles_post_ra>
